<compile_context>
chip_gen: v6e
topology: v6e:2x2x1
jax: 0.10.0
libtpu: 0.0.40
codegen_flags: <defaults>
</compile_context>

<pallas_src>
import functools

import jax
import jax.numpy as jnp
from jax.experimental import pallas as pl
from jax.experimental.pallas import tpu as pltpu


LANE = 128
SUBLANE = 8


def _cdiv(a, b):
    return -(-a // b)


def _round_up(v, m):
    return _cdiv(v, m) * m


def _padded_bytes(shape, dtype):
    """VMEM footprint of one block, accounting for (8, 128) tile padding."""
    dims = list(shape)
    dims[-1] = _round_up(dims[-1], LANE)
    if len(dims) >= 2:
        dims[-2] = _round_up(dims[-2], SUBLANE)
    n = 1
    for d in dims:
        n *= d
    return n * jnp.dtype(dtype).itemsize


def _vmem_limit(*block_specs):
    # Double-buffered blocks + headroom for compiler scratch; clamped well
    # below the smallest physical VMEM (v7x: 64 MiB per TensorCore).
    total = sum(_padded_bytes(s, d) for s, d in block_specs)
    return int(min(2 * total + (8 << 20), 32 << 20))


def _images_per_block(batch, max_imgs=8):
    """Largest divisor of `batch` that still leaves >= 2 grid steps.

    >= 2 grid steps keeps both v7x TensorCores busy; several images per step
    amortize the ~0.35 us per-grid-step overhead at larger batches.
    """
    best = 1
    for d in range(1, min(max_imgs, batch) + 1):
        if batch % d == 0 and (batch // d >= 2 or batch == 1):
            best = d
    return best


# ----------------------------------------------------------------------------
# Pallas kernels
# ----------------------------------------------------------------------------
def _conv_mm_kernel(x_ref, w_ref, b_ref, o_ref, *, imgs, rows, pad_rows):
    # Fused matmul + bias + ReLU per image.  Weights/bias use constant block
    # indices so they stay VMEM-resident; bf16 operands, f32 accumulation.
    for t in range(imgs):
        acc = jnp.dot(x_ref[t], w_ref[...], preferred_element_type=jnp.float32)
        y = jnp.maximum(acc + b_ref[...], 0.0).astype(o_ref.dtype)
        o_ref[t, :rows, :] = y
        if pad_rows:
            # Explicit zeros for the fc1-flatten padding rows so the (zero)
            # fc1 weight rows never multiply stale-VMEM garbage (NaN-safe).
            o_ref[t, rows:, :] = jnp.zeros((pad_rows, o_ref.shape[-1]),
                                           o_ref.dtype)


def _fc_head_kernel(x_ref, w4_ref, b4_ref, w5_ref, b5_ref, o_ref, acc_ref):
    # K-streamed fc1 into an f32 VMEM accumulator; LeakyReLU(0.01) + fc2 fused
    # on the last K step.  w4 K-tiles are double-buffered by the pipeline so
    # the dominant weight DMA overlaps compute; w5 stays resident.
    k = pl.program_id(1)

    @pl.when(k == 0)
    def _():
        acc_ref[...] = jnp.zeros_like(acc_ref)

    acc_ref[...] += jnp.dot(x_ref[...], w4_ref[...],
                            preferred_element_type=jnp.float32)

    @pl.when(k == pl.num_programs(1) - 1)
    def _():
        h = acc_ref[...] + b4_ref[...]
        h = jnp.where(h >= 0.0, h, 0.01 * h)          # PyTorch LeakyReLU default
        o = jnp.dot(h.astype(w5_ref.dtype), w5_ref[...],
                    preferred_element_type=jnp.float32)
        o_ref[...] = (o + b5_ref[...]).astype(o_ref.dtype)


# ----------------------------------------------------------------------------
# Pallas wrappers
# ----------------------------------------------------------------------------
def conv_matmul(patches, w, b, *, imgs_per_block, out_rows=None):
    """patches:(B,R,K) bf16, w:(K,N) bf16, b:(1,N) f32 -> (B,out_rows,N) bf16.

    Grid over images ("parallel" for megacore); full-(R,K) blocks mean no M
    padding and no pad/slice glue.  out_rows may exceed R; extra rows are
    written as zeros (used to fold the fc1 flatten padding into conv3's
    output so the fc input is a free reshape view).
    """
    bsz, r, k = patches.shape
    n = w.shape[1]
    out_rows = r if out_rows is None else out_rows
    ib = imgs_per_block
    assert bsz % ib == 0
    kern = functools.partial(_conv_mm_kernel, imgs=ib, rows=r,
                             pad_rows=out_rows - r)
    return pl.pallas_call(
        kern,
        out_shape=jax.ShapeDtypeStruct((bsz, out_rows, n), jnp.bfloat16),
        grid=(bsz // ib,),
        in_specs=[
            pl.BlockSpec((ib, r, k), lambda i: (i, 0, 0)),   # per-image patches
            pl.BlockSpec((k, n), lambda i: (0, 0)),          # resident weight
            pl.BlockSpec((1, n), lambda i: (0, 0)),          # resident bias
        ],
        out_specs=pl.BlockSpec((ib, out_rows, n), lambda i: (i, 0, 0)),
        compiler_params=pltpu.CompilerParams(
            dimension_semantics=("parallel",),
            vmem_limit_bytes=_vmem_limit(
                ((ib, r, k), jnp.bfloat16),
                ((k, n), jnp.bfloat16),
                ((1, n), jnp.float32),
                ((ib, out_rows, n), jnp.bfloat16)),
        ),
    )(patches, w, b)


def fc_head(x, w4, b4, w5, b5, *, k_tile):
    """Fused fc1 + LeakyReLU + fc2 with a K-streamed fc1 weight.

    x:(B,Kp) bf16, w4:(Kp,512) bf16 (streamed in k_tile chunks), w5:(512,A)
    bf16 resident.  Output is native (B, A) f32 (no padding / slicing).
    """
    bsz, kp = x.shape
    n1 = w4.shape[1]
    n2 = w5.shape[1]
    assert kp % k_tile == 0
    kt = kp // k_tile
    if bsz % (2 * SUBLANE) == 0:      # split rows so both v7x cores get work
        tm, gm = bsz // 2, 2
    else:                             # tiny batch: full-batch block (legal)
        tm, gm = bsz, 1
    return pl.pallas_call(
        _fc_head_kernel,
        out_shape=jax.ShapeDtypeStruct((bsz, n2), jnp.float32),
        grid=(gm, kt),
        in_specs=[
            pl.BlockSpec((tm, k_tile), lambda i, k: (i, k)),
            pl.BlockSpec((k_tile, n1), lambda i, k: (k, 0)),   # streamed w4
            pl.BlockSpec((1, n1), lambda i, k: (0, 0)),
            pl.BlockSpec((n1, n2), lambda i, k: (0, 0)),       # resident w5
            pl.BlockSpec((1, n2), lambda i, k: (0, 0)),
        ],
        out_specs=pl.BlockSpec((tm, n2), lambda i, k: (i, 0)),
        scratch_shapes=[pltpu.VMEM((tm, n1), jnp.float32)],
        compiler_params=pltpu.CompilerParams(
            dimension_semantics=("parallel", "arbitrary"),
            vmem_limit_bytes=_vmem_limit(
                ((tm, k_tile), jnp.bfloat16),
                ((k_tile, n1), jnp.bfloat16),
                ((1, n1), jnp.float32),
                ((n1, n2), jnp.bfloat16),
                ((1, n2), jnp.float32),
                ((tm, n2), jnp.float32),
                ((tm, n1), jnp.float32)),
        ),
    )(x, w4, b4, w5, b5)


# ----------------------------------------------------------------------------
# Patch extraction (XLA glue, NHWC, feature order (kh, kw, c))
# ----------------------------------------------------------------------------
def _patches_nhwc(x, kh, kw, stride, extra_zero_cols=0):
    """x:(B,H,W,C) -> (B, OH*OW, KH*KW*C + extra) patches.

    extra_zero_cols appends explicit zero feature columns inside the same
    concat so the contraction dim is lane-aligned with no separate pad op.
    """
    n, h, w, c = x.shape
    oh = (h - kh) // stride + 1
    ow = (w - kw) // stride + 1
    cols = []
    for i in range(kh):
        for j in range(kw):
            cols.append(x[:, i:i + stride * (oh - 1) + 1:stride,
                          j:j + stride * (ow - 1) + 1:stride, :])
    if extra_zero_cols:
        cols.append(jnp.zeros((n, oh, ow, extra_zero_cols), x.dtype))
    p = jnp.concatenate(cols, axis=-1)            # (B, OH, OW, F)
    return p.reshape(n, oh * ow, p.shape[-1]), oh, ow


# ----------------------------------------------------------------------------
# Parameters: PyTorch layouts + one-time conversion to kernel layouts
# ----------------------------------------------------------------------------
def init_params(key, num_actions):
    """PyTorch-layout parameters with PyTorch-default-like fan-in uniform init."""
    def uni(k, shape, fan_in):
        bound = 1.0 / jnp.sqrt(float(fan_in))
        return jax.random.uniform(k, shape, jnp.float32, -bound, bound)

    ks = jax.random.split(key, 10)
    p = {}
    p["w1"] = uni(ks[0], (32, 4, 8, 8), 4 * 8 * 8)
    p["b1"] = uni(ks[1], (32,), 4 * 8 * 8)
    p["w2"] = uni(ks[2], (64, 32, 4, 4), 32 * 4 * 4)
    p["b2"] = uni(ks[3], (64,), 32 * 4 * 4)
    p["w3"] = uni(ks[4], (64, 64, 3, 3), 64 * 3 * 3)
    p["b3"] = uni(ks[5], (64,), 64 * 3 * 3)
    p["w4"] = uni(ks[6], (512, 64 * 7 * 7), 64 * 7 * 7)   # fc1 (out, in), (c,h,w)
    p["b4"] = uni(ks[7], (512,), 64 * 7 * 7)
    p["w5"] = uni(ks[8], (num_actions, 512), 512)          # fc2 (out, in)
    p["b5"] = uni(ks[9], (num_actions,), 512)
    return p


def prepare_params(p, num_actions):
    """One-time (outside the jitted forward) layout/cast of parameters.

    Contraction dims stay at native width; only conv3 (576 -> 640) and fc1
    (3136 -> 3200) get zero K rows so every MXU contraction is lane-aligned.
    """
    def conv_w(w, k_pad=0):
        c_out, c_in, kh, kw = w.shape
        wt = jnp.transpose(w, (2, 3, 1, 0)).reshape(kh * kw * c_in, c_out)
        if k_pad:
            wt = jnp.pad(wt, ((0, k_pad), (0, 0)))
        return wt.astype(jnp.bfloat16)

    def bias_row(b):
        return b.reshape(1, -1).astype(jnp.float32)

    prep = {}
    prep["w1"] = conv_w(p["w1"])            # (256, 32)
    prep["b1"] = bias_row(p["b1"])
    prep["w2"] = conv_w(p["w2"])            # (512, 64)
    prep["b2"] = bias_row(p["b2"])
    prep["w3"] = conv_w(p["w3"], k_pad=64)  # (640, 64), last 64 rows zero
    prep["b3"] = bias_row(p["b3"])
    # fc1: PyTorch flattens conv3 output as (c, h, w); kernel flatten is
    # (h, w, c) with one zero spatial row appended (49 -> 50) => K = 3200.
    w4 = jnp.transpose(p["w4"].reshape(512, 64, 7, 7), (2, 3, 1, 0))
    w4 = w4.reshape(7 * 7 * 64, 512)
    prep["w4"] = jnp.pad(w4, ((0, 64), (0, 0))).astype(jnp.bfloat16)  # (3200, 512)
    prep["b4"] = bias_row(p["b4"])
    prep["w5"] = p["w5"].T.astype(jnp.bfloat16)                       # (512, A)
    prep["b5"] = bias_row(p["b5"])
    return prep


# ----------------------------------------------------------------------------
# DQN forward
# ----------------------------------------------------------------------------
def dqn_forward(prep, x):
    # x: (B, 4, 84, 84) f32 NCHW  ->  (B, num_actions) f32
    bsz = x.shape[0]
    ib = _images_per_block(bsz)
    # Single small NHWC + bf16 conversion of the input; everything downstream
    # stays bf16 NHWC at native channel widths (32 / 64).  (bf16 activations
    # => expect ~1e-2 relative deviation vs a float32 PyTorch reference.)
    x = jnp.transpose(x, (0, 2, 3, 1)).astype(jnp.bfloat16)

    p1, oh1, ow1 = _patches_nhwc(x, 8, 8, 4)                    # (B, 400, 256)
    a1 = conv_matmul(p1, prep["w1"], prep["b1"],
                     imgs_per_block=ib)                          # (B, 400, 32)

    p2, oh2, ow2 = _patches_nhwc(a1.reshape(bsz, oh1, ow1, 32),
                                 4, 4, 2)                        # (B, 81, 512)
    a2 = conv_matmul(p2, prep["w2"], prep["b2"],
                     imgs_per_block=ib)                          # (B, 81, 64)

    p3, _, _ = _patches_nhwc(a2.reshape(bsz, oh2, ow2, 64), 3, 3, 1,
                             extra_zero_cols=64)                 # (B, 49, 640)
    # out_rows=50: the kernel-written zero row makes the (h, w, c) flatten
    # land on a lane-aligned K of 3200 with no pad/copy of the activation.
    a3 = conv_matmul(p3, prep["w3"], prep["b3"],
                     imgs_per_block=ib, out_rows=50)             # (B, 50, 64)

    fc_in = a3.reshape(bsz, 50 * 64)                             # free view
    return fc_head(fc_in, prep["w4"], prep["b4"], prep["w5"], prep["b5"],
                   k_tile=640)


if __name__ == "__main__":
    num_actions = 6
    batch = 2

    key = jax.random.PRNGKey(0)
    k_params, k_x = jax.random.split(key)
    params = init_params(k_params, num_actions)
    prep = prepare_params(params, num_actions)       # one-time layout/cast

    # The architecture fixes the spatial size: 84 -> 20 -> 9 -> 7 (= 64*7*7 fc input).
    x = jax.random.normal(k_x, (batch, 4, 84, 84), dtype=jnp.float32)

    fwd = jax.jit(dqn_forward)
    out = jax.block_until_ready(fwd(prep, x))
    assert out.shape == (batch, num_actions), out.shape
    assert out.dtype == jnp.float32
    print("KERNEL_OK")
</pallas_src>

<mosaic_0001>
module attributes {stable_mosaic.version = 11 : i64} {
  func.func @_conv_mm_kernel(%arg0: i32, %arg1: memref<1x400x256xbf16, #tpu.memory_space<vmem>>, %arg2: memref<256x32xbf16, #tpu.memory_space<vmem>>, %arg3: memref<1x32xf32, #tpu.memory_space<vmem>>, %arg4: memref<1x400x32xbf16, #tpu.memory_space<vmem>>) attributes {dimension_semantics = [#tpu.dimension_semantics<parallel>], iteration_bounds = array<i64: 2>, scalar_prefetch = 0 : i64, scratch_operands = 0 : i64, tpu.core_type = #tpu.core_type<tc>, window_params = [{transform_indices = @transform_0, window_bounds = array<i64: 1, 400, 256>}, {pipeline_mode = #tpu.pipeline_mode<synchronous>, transform_indices = @transform_1, window_bounds = array<i64: 256, 32>}, {pipeline_mode = #tpu.pipeline_mode<synchronous>, transform_indices = @transform_2, window_bounds = array<i64: 1, 32>}, {transform_indices = @transform_3, window_bounds = array<i64: 1, 400, 32>}]} {
    %c0 = arith.constant 0 : index
    %c0_0 = arith.constant 0 : index
    %c0_1 = arith.constant 0 : index
    %0 = vector.load %arg1[%c0, %c0_0, %c0_1] : memref<1x400x256xbf16, #tpu.memory_space<vmem>>, vector<1x400x256xbf16>
    %1 = vector.shape_cast %0 : vector<1x400x256xbf16> to vector<400x256xbf16>
    %c0_2 = arith.constant 0 : index
    %c0_3 = arith.constant 0 : index
    %2 = vector.load %arg2[%c0_2, %c0_3] : memref<256x32xbf16, #tpu.memory_space<vmem>>, vector<256x32xbf16>
    %cst = arith.constant dense<0.000000e+00> : vector<400x32xf32>
    %3 = tpu.matmul %1, %2, %cst {dimension_numbers = #tpu.dot_dimension_numbers<[1], [0], [0], [1], [0, 0, 1, 1], [], []>} : vector<400x256xbf16>, vector<256x32xbf16>, vector<400x32xf32> -> vector<400x32xf32>
    %c0_4 = arith.constant 0 : index
    %c0_5 = arith.constant 0 : index
    %4 = vector.load %arg3[%c0_4, %c0_5] : memref<1x32xf32, #tpu.memory_space<vmem>>, vector<1x32xf32>
    %5 = vector.broadcast %4 : vector<1x32xf32> to vector<400x32xf32>
    %6 = arith.addf %3, %5 : vector<400x32xf32>
    %cst_6 = arith.constant 0.000000e+00 : f32
    %7 = vector.broadcast %cst_6 : f32 to vector<400x32xf32>
    %8 = arith.maximumf %6, %7 : vector<400x32xf32>
    %9 = arith.truncf %8 : vector<400x32xf32> to vector<400x32xbf16>
    %c0_7 = arith.constant 0 : index
    %c0_8 = arith.constant 0 : index
    %c0_9 = arith.constant 0 : index
    %10 = vector.load %arg4[%c0_7, %c0_8, %c0_9] : memref<1x400x32xbf16, #tpu.memory_space<vmem>>, vector<1x400x32xbf16>
    %11 = vector.shape_cast %10 : vector<1x400x32xbf16> to vector<400x32xbf16>
    %12 = vector.shape_cast %9 : vector<400x32xbf16> to vector<1x400x32xbf16>
    tpu.vector_store %arg4[%c0_7, %c0_8, %c0_9], %12 {strides = array<i32>} : memref<1x400x32xbf16, #tpu.memory_space<vmem>>, vector<1x400x32xbf16>,
    return
  }
  func.func @transform_0(%arg0: i32) -> (i32, i32, i32) {
    %c0_i32 = arith.constant 0 : i32
    %c0_i32_0 = arith.constant 0 : i32
    %c0_i32_1 = arith.constant 0 : i32
    return %arg0, %c0_i32, %c0_i32_0 : i32, i32, i32
  }
  func.func @transform_1(%arg0: i32) -> (i32, i32) {
    %c0_i32 = arith.constant 0 : i32
    %c0_i32_0 = arith.constant 0 : i32
    %c0_i32_1 = arith.constant 0 : i32
    return %c0_i32, %c0_i32_0 : i32, i32
  }
  func.func @transform_2(%arg0: i32) -> (i32, i32) {
    %c0_i32 = arith.constant 0 : i32
    %c0_i32_0 = arith.constant 0 : i32
    %c0_i32_1 = arith.constant 0 : i32
    return %c0_i32, %c0_i32_0 : i32, i32
  }
  func.func @transform_3(%arg0: i32) -> (i32, i32, i32) {
    %c0_i32 = arith.constant 0 : i32
    %c0_i32_0 = arith.constant 0 : i32
    %c0_i32_1 = arith.constant 0 : i32
    return %arg0, %c0_i32, %c0_i32_0 : i32, i32, i32
  }
}

module attributes {stable_mosaic.version = 11 : i64} {
  func.func @_conv_mm_kernel(%arg0: i32, %arg1: memref<1x81x512xbf16, #tpu.memory_space<vmem>>, %arg2: memref<512x64xbf16, #tpu.memory_space<vmem>>, %arg3: memref<1x64xf32, #tpu.memory_space<vmem>>, %arg4: memref<1x81x64xbf16, #tpu.memory_space<vmem>>) attributes {dimension_semantics = [#tpu.dimension_semantics<parallel>], iteration_bounds = array<i64: 2>, scalar_prefetch = 0 : i64, scratch_operands = 0 : i64, tpu.core_type = #tpu.core_type<tc>, window_params = [{transform_indices = @transform_0, window_bounds = array<i64: 1, 81, 512>}, {pipeline_mode = #tpu.pipeline_mode<synchronous>, transform_indices = @transform_1, window_bounds = array<i64: 512, 64>}, {pipeline_mode = #tpu.pipeline_mode<synchronous>, transform_indices = @transform_2, window_bounds = array<i64: 1, 64>}, {transform_indices = @transform_3, window_bounds = array<i64: 1, 81, 64>}]} {
    %c0 = arith.constant 0 : index
    %c0_0 = arith.constant 0 : index
    %c0_1 = arith.constant 0 : index
    %0 = vector.load %arg1[%c0, %c0_0, %c0_1] : memref<1x81x512xbf16, #tpu.memory_space<vmem>>, vector<1x81x512xbf16>
    %1 = vector.shape_cast %0 : vector<1x81x512xbf16> to vector<81x512xbf16>
    %c0_2 = arith.constant 0 : index
    %c0_3 = arith.constant 0 : index
    %2 = vector.load %arg2[%c0_2, %c0_3] : memref<512x64xbf16, #tpu.memory_space<vmem>>, vector<512x64xbf16>
    %cst = arith.constant dense<0.000000e+00> : vector<81x64xf32>
    %3 = tpu.matmul %1, %2, %cst {dimension_numbers = #tpu.dot_dimension_numbers<[1], [0], [0], [1], [0, 0, 1, 1], [], []>} : vector<81x512xbf16>, vector<512x64xbf16>, vector<81x64xf32> -> vector<81x64xf32>
    %c0_4 = arith.constant 0 : index
    %c0_5 = arith.constant 0 : index
    %4 = vector.load %arg3[%c0_4, %c0_5] : memref<1x64xf32, #tpu.memory_space<vmem>>, vector<1x64xf32>
    %5 = vector.broadcast %4 : vector<1x64xf32> to vector<81x64xf32>
    %6 = arith.addf %3, %5 : vector<81x64xf32>
    %cst_6 = arith.constant 0.000000e+00 : f32
    %7 = vector.broadcast %cst_6 : f32 to vector<81x64xf32>
    %8 = arith.maximumf %6, %7 : vector<81x64xf32>
    %9 = arith.truncf %8 : vector<81x64xf32> to vector<81x64xbf16>
    %c0_7 = arith.constant 0 : index
    %c0_8 = arith.constant 0 : index
    %c0_9 = arith.constant 0 : index
    %10 = vector.load %arg4[%c0_7, %c0_8, %c0_9] : memref<1x81x64xbf16, #tpu.memory_space<vmem>>, vector<1x81x64xbf16>
    %11 = vector.shape_cast %10 : vector<1x81x64xbf16> to vector<81x64xbf16>
    %12 = vector.shape_cast %9 : vector<81x64xbf16> to vector<1x81x64xbf16>
    tpu.vector_store %arg4[%c0_7, %c0_8, %c0_9], %12 {strides = array<i32>} : memref<1x81x64xbf16, #tpu.memory_space<vmem>>, vector<1x81x64xbf16>,
    return
  }
  func.func @transform_0(%arg0: i32) -> (i32, i32, i32) {
    %c0_i32 = arith.constant 0 : i32
    %c0_i32_0 = arith.constant 0 : i32
    %c0_i32_1 = arith.constant 0 : i32
    return %arg0, %c0_i32, %c0_i32_0 : i32, i32, i32
  }
  func.func @transform_1(%arg0: i32) -> (i32, i32) {
    %c0_i32 = arith.constant 0 : i32
    %c0_i32_0 = arith.constant 0 : i32
    %c0_i32_1 = arith.constant 0 : i32
    return %c0_i32, %c0_i32_0 : i32, i32
  }
  func.func @transform_2(%arg0: i32) -> (i32, i32) {
    %c0_i32 = arith.constant 0 : i32
    %c0_i32_0 = arith.constant 0 : i32
    %c0_i32_1 = arith.constant 0 : i32
    return %c0_i32, %c0_i32_0 : i32, i32
  }
  func.func @transform_3(%arg0: i32) -> (i32, i32, i32) {
    %c0_i32 = arith.constant 0 : i32
    %c0_i32_0 = arith.constant 0 : i32
    %c0_i32_1 = arith.constant 0 : i32
    return %arg0, %c0_i32, %c0_i32_0 : i32, i32, i32
  }
}

module attributes {stable_mosaic.version = 11 : i64} {
  func.func @_conv_mm_kernel(%arg0: i32, %arg1: memref<1x49x640xbf16, #tpu.memory_space<vmem>>, %arg2: memref<640x64xbf16, #tpu.memory_space<vmem>>, %arg3: memref<1x64xf32, #tpu.memory_space<vmem>>, %arg4: memref<1x50x64xbf16, #tpu.memory_space<vmem>>) attributes {dimension_semantics = [#tpu.dimension_semantics<parallel>], iteration_bounds = array<i64: 2>, scalar_prefetch = 0 : i64, scratch_operands = 0 : i64, tpu.core_type = #tpu.core_type<tc>, window_params = [{transform_indices = @transform_0, window_bounds = array<i64: 1, 49, 640>}, {pipeline_mode = #tpu.pipeline_mode<synchronous>, transform_indices = @transform_1, window_bounds = array<i64: 640, 64>}, {pipeline_mode = #tpu.pipeline_mode<synchronous>, transform_indices = @transform_2, window_bounds = array<i64: 1, 64>}, {transform_indices = @transform_3, window_bounds = array<i64: 1, 50, 64>}]} {
    %c0 = arith.constant 0 : index
    %c0_0 = arith.constant 0 : index
    %c0_1 = arith.constant 0 : index
    %0 = vector.load %arg1[%c0, %c0_0, %c0_1] : memref<1x49x640xbf16, #tpu.memory_space<vmem>>, vector<1x49x640xbf16>
    %1 = vector.shape_cast %0 : vector<1x49x640xbf16> to vector<49x640xbf16>
    %c0_2 = arith.constant 0 : index
    %c0_3 = arith.constant 0 : index
    %2 = vector.load %arg2[%c0_2, %c0_3] : memref<640x64xbf16, #tpu.memory_space<vmem>>, vector<640x64xbf16>
    %cst = arith.constant dense<0.000000e+00> : vector<49x64xf32>
    %3 = tpu.matmul %1, %2, %cst {dimension_numbers = #tpu.dot_dimension_numbers<[1], [0], [0], [1], [0, 0, 1, 1], [], []>} : vector<49x640xbf16>, vector<640x64xbf16>, vector<49x64xf32> -> vector<49x64xf32>
    %c0_4 = arith.constant 0 : index
    %c0_5 = arith.constant 0 : index
    %4 = vector.load %arg3[%c0_4, %c0_5] : memref<1x64xf32, #tpu.memory_space<vmem>>, vector<1x64xf32>
    %5 = vector.broadcast %4 : vector<1x64xf32> to vector<49x64xf32>
    %6 = arith.addf %3, %5 : vector<49x64xf32>
    %cst_6 = arith.constant 0.000000e+00 : f32
    %7 = vector.broadcast %cst_6 : f32 to vector<49x64xf32>
    %8 = arith.maximumf %6, %7 : vector<49x64xf32>
    %9 = arith.truncf %8 : vector<49x64xf32> to vector<49x64xbf16>
    %c0_7 = arith.constant 0 : index
    %c0_8 = arith.constant 0 : index
    %c0_9 = arith.constant 0 : index
    %10 = vector.load %arg4[%c0_7, %c0_8, %c0_9] : memref<1x50x64xbf16, #tpu.memory_space<vmem>>, vector<1x49x64xbf16>
    %11 = vector.shape_cast %10 : vector<1x49x64xbf16> to vector<49x64xbf16>
    %12 = vector.shape_cast %9 : vector<49x64xbf16> to vector<1x49x64xbf16>
    tpu.vector_store %arg4[%c0_7, %c0_8, %c0_9], %12 {strides = array<i32>} : memref<1x50x64xbf16, #tpu.memory_space<vmem>>, vector<1x49x64xbf16>,
    %cst_10 = arith.constant 0.000000e+00 : bf16
    %13 = vector.broadcast %cst_10 : bf16 to vector<1x64xbf16>
    %c0_11 = arith.constant 0 : index
    %c49 = arith.constant 49 : index
    %c0_12 = arith.constant 0 : index
    %14 = vector.load %arg4[%c0_11, %c49, %c0_12] : memref<1x50x64xbf16, #tpu.memory_space<vmem>>, vector<1x1x64xbf16>
    %15 = vector.shape_cast %14 : vector<1x1x64xbf16> to vector<1x64xbf16>
    %16 = vector.shape_cast %13 : vector<1x64xbf16> to vector<1x1x64xbf16>
    tpu.vector_store %arg4[%c0_11, %c49, %c0_12], %16 {strides = array<i32>} : memref<1x50x64xbf16, #tpu.memory_space<vmem>>, vector<1x1x64xbf16>,
    return
  }
  func.func @transform_0(%arg0: i32) -> (i32, i32, i32) {
    %c0_i32 = arith.constant 0 : i32
    %c0_i32_0 = arith.constant 0 : i32
    %c0_i32_1 = arith.constant 0 : i32
    return %arg0, %c0_i32, %c0_i32_0 : i32, i32, i32
  }
  func.func @transform_1(%arg0: i32) -> (i32, i32) {
    %c0_i32 = arith.constant 0 : i32
    %c0_i32_0 = arith.constant 0 : i32
    %c0_i32_1 = arith.constant 0 : i32
    return %c0_i32, %c0_i32_0 : i32, i32
  }
  func.func @transform_2(%arg0: i32) -> (i32, i32) {
    %c0_i32 = arith.constant 0 : i32
    %c0_i32_0 = arith.constant 0 : i32
    %c0_i32_1 = arith.constant 0 : i32
    return %c0_i32, %c0_i32_0 : i32, i32
  }
  func.func @transform_3(%arg0: i32) -> (i32, i32, i32) {
    %c0_i32 = arith.constant 0 : i32
    %c0_i32_0 = arith.constant 0 : i32
    %c0_i32_1 = arith.constant 0 : i32
    return %arg0, %c0_i32, %c0_i32_0 : i32, i32, i32
  }
}

module attributes {stable_mosaic.version = 11 : i64} {
  func.func @_fc_head_kernel(%arg0: i32, %arg1: i32, %arg2: memref<2x640xbf16, #tpu.memory_space<vmem>>, %arg3: memref<640x512xbf16, #tpu.memory_space<vmem>>, %arg4: memref<1x512xf32, #tpu.memory_space<vmem>>, %arg5: memref<512x6xbf16, #tpu.memory_space<vmem>>, %arg6: memref<1x6xf32, #tpu.memory_space<vmem>>, %arg7: memref<2x6xf32, #tpu.memory_space<vmem>>, %arg8: memref<2x512xf32, #tpu.memory_space<vmem>>) attributes {dimension_semantics = [#tpu.dimension_semantics<parallel>, #tpu.dimension_semantics<arbitrary>], iteration_bounds = array<i64: 1, 5>, scalar_prefetch = 0 : i64, scratch_operands = 1 : i64, tpu.core_type = #tpu.core_type<tc>, window_params = [{transform_indices = @transform_0, window_bounds = array<i64: 2, 640>}, {transform_indices = @transform_1, window_bounds = array<i64: 640, 512>}, {pipeline_mode = #tpu.pipeline_mode<synchronous>, transform_indices = @transform_2, window_bounds = array<i64: 1, 512>}, {pipeline_mode = #tpu.pipeline_mode<synchronous>, transform_indices = @transform_3, window_bounds = array<i64: 512, 6>}, {pipeline_mode = #tpu.pipeline_mode<synchronous>, transform_indices = @transform_4, window_bounds = array<i64: 1, 6>}, {transform_indices = @transform_5, window_bounds = array<i64: 2, 6>}]} {
    %c0_i32 = arith.constant 0 : i32
    %0 = arith.cmpi eq, %arg1, %c0_i32 : i32
    %1 = arith.extui %0 : i1 to i32
    %c0_i32_0 = arith.constant 0 : i32
    %2 = arith.cmpi ne, %1, %c0_i32_0 : i32
    scf.if %2 {
      %cst_9 = arith.constant 0.000000e+00 : f32
      %12 = vector.broadcast %cst_9 : f32 to vector<2x512xf32>
      %c0_10 = arith.constant 0 : index
      %c0_11 = arith.constant 0 : index
      %13 = vector.load %arg8[%c0_10, %c0_11] : memref<2x512xf32, #tpu.memory_space<vmem>>, vector<2x512xf32>
      tpu.vector_store %arg8[%c0_10, %c0_11], %12 {strides = array<i32>} : memref<2x512xf32, #tpu.memory_space<vmem>>, vector<2x512xf32>,
    } else {
    }
    %c0 = arith.constant 0 : index
    %c0_1 = arith.constant 0 : index
    %3 = vector.load %arg8[%c0, %c0_1] : memref<2x512xf32, #tpu.memory_space<vmem>>, vector<2x512xf32>
    %c0_2 = arith.constant 0 : index
    %c0_3 = arith.constant 0 : index
    %4 = vector.load %arg2[%c0_2, %c0_3] : memref<2x640xbf16, #tpu.memory_space<vmem>>, vector<2x640xbf16>
    %c0_4 = arith.constant 0 : index
    %c0_5 = arith.constant 0 : index
    %5 = vector.load %arg3[%c0_4, %c0_5] : memref<640x512xbf16, #tpu.memory_space<vmem>>, vector<640x512xbf16>
    %cst = arith.constant dense<0.000000e+00> : vector<2x512xf32>
    %6 = tpu.matmul %4, %5, %cst {dimension_numbers = #tpu.dot_dimension_numbers<[1], [0], [0], [1], [0, 0, 1, 1], [], []>} : vector<2x640xbf16>, vector<640x512xbf16>, vector<2x512xf32> -> vector<2x512xf32>
    %7 = arith.addf %3, %6 : vector<2x512xf32>
    %c0_6 = arith.constant 0 : index
    %c0_7 = arith.constant 0 : index
    %8 = vector.load %arg8[%c0_6, %c0_7] : memref<2x512xf32, #tpu.memory_space<vmem>>, vector<2x512xf32>
    tpu.vector_store %arg8[%c0_6, %c0_7], %7 {strides = array<i32>} : memref<2x512xf32, #tpu.memory_space<vmem>>, vector<2x512xf32>,
    %c4_i32 = arith.constant 4 : i32
    %9 = arith.cmpi eq, %arg1, %c4_i32 : i32
    %10 = arith.extui %9 : i1 to i32
    %c0_i32_8 = arith.constant 0 : i32
    %11 = arith.cmpi ne, %10, %c0_i32_8 : i32
    scf.if %11 {
      %c0_9 = arith.constant 0 : index
      %c0_10 = arith.constant 0 : index
      %12 = vector.load %arg8[%c0_9, %c0_10] : memref<2x512xf32, #tpu.memory_space<vmem>>, vector<2x512xf32>
      %c0_11 = arith.constant 0 : index
      %c0_12 = arith.constant 0 : index
      %13 = vector.load %arg4[%c0_11, %c0_12] : memref<1x512xf32, #tpu.memory_space<vmem>>, vector<1x512xf32>
      %14 = vector.broadcast %13 : vector<1x512xf32> to vector<2x512xf32>
      %15 = arith.addf %12, %14 : vector<2x512xf32>
      %cst_13 = arith.constant 0.000000e+00 : f32
      %16 = vector.broadcast %cst_13 : f32 to vector<2x512xf32>
      %17 = arith.cmpf oge, %15, %16 : vector<2x512xf32>
      %cst_14 = arith.constant 0.00999999977 : f32
      %18 = vector.broadcast %cst_14 : f32 to vector<2x512xf32>
      %19 = arith.mulf %18, %15 : vector<2x512xf32>
      %20 = arith.select %17, %15, %19 : vector<2x512xi1>, vector<2x512xf32>
      %21 = arith.truncf %20 : vector<2x512xf32> to vector<2x512xbf16>
      %c0_15 = arith.constant 0 : index
      %c0_16 = arith.constant 0 : index
      %22 = vector.load %arg5[%c0_15, %c0_16] : memref<512x6xbf16, #tpu.memory_space<vmem>>, vector<512x6xbf16>
      %cst_17 = arith.constant dense<0.000000e+00> : vector<2x6xf32>
      %23 = tpu.matmul %21, %22, %cst_17 {dimension_numbers = #tpu.dot_dimension_numbers<[1], [0], [0], [1], [0, 0, 1, 1], [], []>} : vector<2x512xbf16>, vector<512x6xbf16>, vector<2x6xf32> -> vector<2x6xf32>
      %c0_18 = arith.constant 0 : index
      %c0_19 = arith.constant 0 : index
      %24 = vector.load %arg6[%c0_18, %c0_19] : memref<1x6xf32, #tpu.memory_space<vmem>>, vector<1x6xf32>
      %25 = vector.broadcast %24 : vector<1x6xf32> to vector<2x6xf32>
      %26 = arith.addf %23, %25 : vector<2x6xf32>
      %c0_20 = arith.constant 0 : index
      %c0_21 = arith.constant 0 : index
      %27 = vector.load %arg7[%c0_20, %c0_21] : memref<2x6xf32, #tpu.memory_space<vmem>>, vector<2x6xf32>
      tpu.vector_store %arg7[%c0_20, %c0_21], %26 {strides = array<i32>} : memref<2x6xf32, #tpu.memory_space<vmem>>, vector<2x6xf32>,
    } else {
    }
    return
  }
  func.func @transform_0(%arg0: i32, %arg1: i32) -> (i32, i32) {
    %c0_i32 = arith.constant 0 : i32
    return %arg0, %arg1 : i32, i32
  }
  func.func @transform_1(%arg0: i32, %arg1: i32) -> (i32, i32) {
    %c0_i32 = arith.constant 0 : i32
    %c0_i32_0 = arith.constant 0 : i32
    return %arg1, %c0_i32 : i32, i32
  }
  func.func @transform_2(%arg0: i32, %arg1: i32) -> (i32, i32) {
    %c0_i32 = arith.constant 0 : i32
    %c0_i32_0 = arith.constant 0 : i32
    %c0_i32_1 = arith.constant 0 : i32
    return %c0_i32, %c0_i32_0 : i32, i32
  }
  func.func @transform_3(%arg0: i32, %arg1: i32) -> (i32, i32) {
    %c0_i32 = arith.constant 0 : i32
    %c0_i32_0 = arith.constant 0 : i32
    %c0_i32_1 = arith.constant 0 : i32
    return %c0_i32, %c0_i32_0 : i32, i32
  }
  func.func @transform_4(%arg0: i32, %arg1: i32) -> (i32, i32) {
    %c0_i32 = arith.constant 0 : i32
    %c0_i32_0 = arith.constant 0 : i32
    %c0_i32_1 = arith.constant 0 : i32
    return %c0_i32, %c0_i32_0 : i32, i32
  }
  func.func @transform_5(%arg0: i32, %arg1: i32) -> (i32, i32) {
    %c0_i32 = arith.constant 0 : i32
    %c0_i32_0 = arith.constant 0 : i32
    return %arg0, %c0_i32 : i32, i32
  }
}

</mosaic_0001>

<bundles_post_ra>
// kernel: dqn_forward.4
= control target key start
LH: loop header
LB: loop body
LE: loop exit
PB: predicated region body
PF: predicated region fallthrough
CT: control target
= control target key end

     0   :  { %s1535_s12 = smov 0   ;;  %s1845_s0 = inlined_call_operand.vmem [shape: bf16[2,400,256], index: 0, kind: input, shape index: {}]   ;;  %s1846_s1 = inlined_call_operand.vmem [shape: bf16[256,32], index: 1, kind: input, shape index: {}]   ;;  %s1847_s2 = inlined_call_operand.vmem [shape: f32[1,32], index: 2, kind: input, shape index: {}]   ;;  %s1848_s3 = inlined_call_operand.vmem [shape: bf16[2,400,32], index: 3, kind: output, shape index: {}]  }
   0x1 LB: > { %s1196_s13 = sadd.s32 4294967295, %s1512_s12   ;;  %p1200_p0 = scmp.ge.s32.totalorder %s1512_s12, 1  ;;  %s1512_s12 = sphi %s1535_s12, %s13_s12  }
   0x2   : > { %p137_p1 = scmp.lt.s32.totalorder %s1512_s12, 3 }
   0x4   : > { %p138_p2 = pnand %p1200_p0, %p137_p1 }
   0x5   : > { %p161_p3 = scmp.lt.s32.totalorder (!%p138_p2), %s1196_s13, 1 }
   0x6   : > { %141 = sbr.rel (%p138_p2) target bundleno = 376 (0x178), region = 32 }
   0xb   : > { %v1415_v0 = vld [vmem:[%s1846_s1 + $0x38] sm:$0xff]   ;;  %v1514_v1 = vmov 0   ;;  %v1416_v2 = vld [vmem:[%s1846_s1 + $0x30] sm:$0xff]   ;;  %v1417_v3 = vld [vmem:[%s1846_s1 + $0x28] sm:$0xff]   ;;  %s1850_s13 = smov (!%p161_p3, %s1196_s13), 1  ;;  %vm1090_vm0 = vcmask 257024  }
   0xc   : > { %607 = vmatprep.subr.bf16.mxu0 %v1514_v1  ;;  %1372 = vmatprep.subr.bf16.mxu1 %v1514_v1  ;;  %v1418_v4 = vld [vmem:[%s1846_s1 + $0x20] sm:$0xff]   ;;  %s1404_s22 = smul.u32 400, %s1850_s13  ;;  %v1419_v5 = vld [vmem:[%s1846_s1 + $0x18] sm:$0xff]   ;;  %v1420_v7 = vld [vmem:[%s1846_s1 + $0x10] sm:$0xff]  }
   0xd   : > { %608 = vmatpush1.bf16.msra.mxu0 %v1415_v0  ;;  %1388 = vmatpush1.bf16.msra.mxu1 %v1415_v0  ;;  %v1421_v9 = vld [vmem:[%s1846_s1 + $0x8] sm:$0xff]   ;;  %v1422_v10 = vld [vmem:[%s1846_s1] sm:$0xff]   ;;  %v1423_v11 = vld [vmem:[%s1846_s1 + $0x78] sm:$0xff]   ;;  %s1405_s28 = smul.u32 200, %s1850_s13 }
   0xe   : > { %609 = vmatprep.subr.bf16.mxu0 %v1514_v1  ;;  %1373 = vmatprep.subr.bf16.mxu1 %v1514_v1  ;;  %s1572_s27 = scalar_lea.vmem %s1845_s0, %s1404_s22  ;;  %v1424_v12 = vld [vmem:[%s1846_s1 + $0x70] sm:$0xff]   ;;  %v1425_v13 = vld [vmem:[%s1846_s1 + $0x68] sm:$0xff]   ;;  %v1426_v14 = vld [vmem:[%s1846_s1 + $0x60] sm:$0xff]  }
   0xf   : > { %v1433_v6 = vld [vmem:[%s1572_s27 + $0x4] ss:$8 sps:$4 sm:$0xff]   ;;  %v1436_v8 = vld [vmem:[%s1572_s27 + $0xd4] ss:$8 sps:$4 sm:$0xff]   ;;  %v1431_v19 = vld [vmem:[%s1572_s27] ss:$8 sps:$4 sm:$0xff]  }
  0x10   : > { %639 = vmatprep.mubr.bf16.mxu0 %v1433_v6  ;;  %743 = vmatprep.mubr.bf16.mxu1 %v1436_v8  ;;  %v1427_v15 = vld [vmem:[%s1846_s1 + $0x58] sm:$0xff]   ;;  %v1428_v16 = vld [vmem:[%s1846_s1 + $0x50] sm:$0xff]   ;;  %v1429_v17 = vld [vmem:[%s1846_s1 + $0x48] sm:$0xff]  }
  0x11   : > { %610 = vmatpush1.bf16.msra.mxu0 %v1416_v2  ;;  %1389 = vmatpush1.bf16.msra.mxu1 %v1416_v2  ;;  %v1430_v18 = vld [vmem:[%s1846_s1 + $0x40] sm:$0xff]   ;;  %v1434_v20 = vld [vmem:[%s1572_s27 + $0xd0] ss:$8 sps:$4 sm:$0xff]   ;;  %v1437_v21 = vld [vmem:[%s1572_s27 + $0x14] ss:$8 sps:$4 sm:$0xff]  }
  0x12   : > { %611 = vmatprep.subr.bf16.mxu0 %v1514_v1  ;;  %1374 = vmatprep.subr.bf16.mxu1 %v1514_v1  ;;  %v1440_v22 = vld [vmem:[%s1572_s27 + $0xe4] ss:$8 sps:$4 sm:$0xff]   ;;  %v1439_v23 = vld [vmem:[%s1572_s27 + $0x10] ss:$8 sps:$4 sm:$0xff]   ;;  %v1442_v24 = vld [vmem:[%s1572_s27 + $0xe0] ss:$8 sps:$4 sm:$0xff]  }
  0x13   : > { %v1443_v25 = vld [vmem:[%s1572_s27 + $0x24] ss:$8 sps:$4 sm:$0xff]   ;;  %v1446_v26 = vld [vmem:[%s1572_s27 + $0xf4] ss:$8 sps:$4 sm:$0xff]   ;;  %v1445_v27 = vld [vmem:[%s1572_s27 + $0x20] ss:$8 sps:$4 sm:$0xff]  }
  0x14   : > { %v1448_v28 = vld [vmem:[%s1572_s27 + $0xf0] ss:$8 sps:$4 sm:$0xff]   ;;  %v1449_v29 = vld [vmem:[%s1572_s27 + $0x34] ss:$8 sps:$4 sm:$0xff]   ;;  %v1452_v30 = vld [vmem:[%s1572_s27 + $0x104] ss:$8 sps:$4 sm:$0xff]  }
  0x15   : > { %612 = vmatpush1.bf16.msra.mxu0 %v1417_v3  ;;  %1390 = vmatpush1.bf16.msra.mxu1 %v1417_v3  ;;  %v1451_v31 = vld [vmem:[%s1572_s27 + $0x30] ss:$8 sps:$4 sm:$0xff]   ;;  %v1454_v32 = vld [vmem:[%s1572_s27 + $0x100] ss:$8 sps:$4 sm:$0xff]   ;;  %v1455_v33 = vld [vmem:[%s1572_s27 + $0x44] ss:$8 sps:$4 sm:$0xff]  }
  0x16   : > { %613 = vmatprep.subr.bf16.mxu0 %v1514_v1  ;;  %1375 = vmatprep.subr.bf16.mxu1 %v1514_v1  ;;  %v1458_v34 = vld [vmem:[%s1572_s27 + $0x114] ss:$8 sps:$4 sm:$0xff]   ;;  %v1457_v35 = vld [vmem:[%s1572_s27 + $0x40] ss:$8 sps:$4 sm:$0xff]   ;;  %v1460_v36 = vld [vmem:[%s1572_s27 + $0x110] ss:$8 sps:$4 sm:$0xff]  }
  0x17   : > { %v1461_v37 = vld [vmem:[%s1572_s27 + $0x54] ss:$8 sps:$4 sm:$0xff]   ;;  %v1464_v38 = vld [vmem:[%s1572_s27 + $0x124] ss:$8 sps:$4 sm:$0xff]   ;;  %v1463_v39 = vld [vmem:[%s1572_s27 + $0x50] ss:$8 sps:$4 sm:$0xff]  }
  0x18   : > { %v1466_v40 = vld [vmem:[%s1572_s27 + $0x120] ss:$8 sps:$4 sm:$0xff]   ;;  %v1467_v41 = vld [vmem:[%s1572_s27 + $0x64] ss:$8 sps:$4 sm:$0xff]   ;;  %v1470_v42 = vld [vmem:[%s1572_s27 + $0x134] ss:$8 sps:$4 sm:$0xff]  }
  0x19   : > { %614 = vmatpush1.bf16.msra.mxu0 %v1418_v4  ;;  %1391 = vmatpush1.bf16.msra.mxu1 %v1418_v4  ;;  %v1469_v43 = vld [vmem:[%s1572_s27 + $0x60] ss:$8 sps:$4 sm:$0xff]   ;;  %v1472_v44 = vld [vmem:[%s1572_s27 + $0x130] ss:$8 sps:$4 sm:$0xff]   ;;  %v1473_v45 = vld [vmem:[%s1572_s27 + $0x74] ss:$8 sps:$4 sm:$0xff]  }
  0x1a   : > { %615 = vmatprep.subr.bf16.mxu0 %v1514_v1  ;;  %1376 = vmatprep.subr.bf16.mxu1 %v1514_v1  ;;  %v1476_v46 = vld [vmem:[%s1572_s27 + $0x144] ss:$8 sps:$4 sm:$0xff]   ;;  %v1475_v47 = vld [vmem:[%s1572_s27 + $0x70] ss:$8 sps:$4 sm:$0xff]   ;;  %v1478_v48 = vld [vmem:[%s1572_s27 + $0x140] ss:$8 sps:$4 sm:$0xff]  }
  0x1b   : > { %v1479_v49 = vld [vmem:[%s1572_s27 + $0x84] ss:$8 sps:$4 sm:$0xff]   ;;  %v1482_v50 = vld [vmem:[%s1572_s27 + $0x154] ss:$8 sps:$4 sm:$0xff]   ;;  %v1481_v51 = vld [vmem:[%s1572_s27 + $0x80] ss:$8 sps:$4 sm:$0xff]  }
  0x1c   : > { %v1484_v52 = vld [vmem:[%s1572_s27 + $0x150] ss:$8 sps:$4 sm:$0xff]   ;;  %v1485_v53 = vld [vmem:[%s1572_s27 + $0x94] ss:$8 sps:$4 sm:$0xff]   ;;  %v1488_v54 = vld [vmem:[%s1572_s27 + $0x164] ss:$8 sps:$4 sm:$0xff]  }
  0x1d   : > { %616 = vmatpush1.bf16.msra.mxu0 %v1419_v5  ;;  %1392 = vmatpush1.bf16.msra.mxu1 %v1419_v5  ;;  %v1487_v55 = vld [vmem:[%s1572_s27 + $0x90] ss:$8 sps:$4 sm:$0xff]   ;;  %v1490_v56 = vld [vmem:[%s1572_s27 + $0x160] ss:$8 sps:$4 sm:$0xff]   ;;  %v1491_v57 = vld [vmem:[%s1572_s27 + $0xa4] ss:$8 sps:$4 sm:$0xff]  }
  0x1e   : > { %617 = vmatprep.subr.bf16.mxu0 %v1514_v1  ;;  %1377 = vmatprep.subr.bf16.mxu1 %v1514_v1  ;;  %v1494_v58 = vld [vmem:[%s1572_s27 + $0x174] ss:$8 sps:$4 sm:$0xff]   ;;  %v1493_v59 = vld [vmem:[%s1572_s27 + $0xa0] ss:$8 sps:$4 sm:$0xff]   ;;  %v1496_v60 = vld [vmem:[%s1572_s27 + $0x170] ss:$8 sps:$4 sm:$0xff]  }
  0x1f   : > { %v1497_v61 = vld [vmem:[%s1572_s27 + $0xb4] ss:$8 sps:$4 sm:$0xff]   ;;  %v1500_v62 = vld [vmem:[%s1572_s27 + $0x184] ss:$8 sps:$4 sm:$0xff]   ;;  %v1499_v63 = vld [vmem:[%s1572_s27 + $0xb0] ss:$8 sps:$4 sm:$0xff]  }
  0x20   : > { %v1502_v0 = vld [vmem:[%s1572_s27 + $0x180] ss:$8 sps:$4 sm:$0xff]  }
  0x21   : > { %618 = vmatpush1.bf16.msra.mxu0 %v1420_v7  ;;  %1393 = vmatpush1.bf16.msra.mxu1 %v1420_v7  ;;  %v1505_v2 = vld [vmem:[%s1572_s27 + $0xc0] ss:$8 sps:$4 sm:$0xff]  }
  0x22   : > { %619 = vmatprep.subr.bf16.mxu0 %v1514_v1  ;;  %1378 = vmatprep.subr.bf16.mxu1 %v1514_v1  ;;  %v1684_v3 = vld [vmem:[%s1847_s2] ss:$0 sm:$0xff] }
  0x25   : > { %620 = vmatpush1.bf16.msra.mxu0 %v1421_v9  ;;  %1394 = vmatpush1.bf16.msra.mxu1 %v1421_v9 }
  0x26   : > { %621 = vmatprep.subr.bf16.mxu0 %v1514_v1  ;;  %1379 = vmatprep.subr.bf16.mxu1 %v1514_v1 }
  0x29   : > { %622 = vmatpush1.bf16.msra.mxu0 %v1422_v10  ;;  %1395 = vmatpush1.bf16.msra.mxu1 %v1422_v10 }
  0x2a   : > { %623 = vmatprep.subr.bf16.mxu0 %v1514_v1  ;;  %1380 = vmatprep.subr.bf16.mxu1 %v1514_v1 }
  0x2d   : > { %624 = vmatpush2.bf16.msra.mxu0 %v1423_v11  ;;  %1396 = vmatpush2.bf16.msra.mxu1 %v1423_v11 }
  0x2e   : > { %625 = vmatprep.subr.bf16.mxu0 %v1514_v1  ;;  %1381 = vmatprep.subr.bf16.mxu1 %v1514_v1 }
  0x31   : > { %626 = vmatpush2.bf16.msra.mxu0 %v1424_v12  ;;  %1397 = vmatpush2.bf16.msra.mxu1 %v1424_v12 }
  0x32   : > { %627 = vmatprep.subr.bf16.mxu0 %v1514_v1  ;;  %1382 = vmatprep.subr.bf16.mxu1 %v1514_v1 }
  0x35   : > { %628 = vmatpush2.bf16.msra.mxu0 %v1425_v13  ;;  %1398 = vmatpush2.bf16.msra.mxu1 %v1425_v13 }
  0x36   : > { %629 = vmatprep.subr.bf16.mxu0 %v1514_v1  ;;  %1383 = vmatprep.subr.bf16.mxu1 %v1514_v1 }
  0x39   : > { %630 = vmatpush2.bf16.msra.mxu0 %v1426_v14  ;;  %1399 = vmatpush2.bf16.msra.mxu1 %v1426_v14 }
  0x3a   : > { %631 = vmatprep.subr.bf16.mxu0 %v1514_v1  ;;  %1384 = vmatprep.subr.bf16.mxu1 %v1514_v1 }
  0x3d   : > { %632 = vmatpush2.bf16.msra.mxu0 %v1427_v15  ;;  %1400 = vmatpush2.bf16.msra.mxu1 %v1427_v15 }
  0x3e   : > { %633 = vmatprep.subr.bf16.mxu0 %v1514_v1  ;;  %1385 = vmatprep.subr.bf16.mxu1 %v1514_v1 }
  0x41   : > { %634 = vmatpush2.bf16.msra.mxu0 %v1428_v16  ;;  %1401 = vmatpush2.bf16.msra.mxu1 %v1428_v16 }
  0x42   : > { %635 = vmatprep.subr.bf16.mxu0 %v1514_v1  ;;  %1386 = vmatprep.subr.bf16.mxu1 %v1514_v1 }
  0x45   : > { %636 = vmatpush2.bf16.msra.mxu0 %v1429_v17  ;;  %1402 = vmatpush2.bf16.msra.mxu1 %v1429_v17 }
  0x46   : > { %637 = vmatprep.subr.bf16.mxu0 %v1514_v1  ;;  %1387 = vmatprep.subr.bf16.mxu1 %v1514_v1  ;;  %v1503_v1 = vld [vmem:[%s1572_s27 + $0xc4] ss:$8 sps:$4 sm:$0xff]   ;;  %s1692_s27 = scalar_lea.vmem %s1848_s3, %s1405_s28 }
  0x49   : > { %638 = vmatpush2.bf16.msra.mxu0 %v1430_v18  ;;  %1403 = vmatpush2.bf16.msra.mxu1 %v1430_v18 }
  0x4c   : > { %640 = vmatmul.mubr.bf16.vlgmr.msra.gmra.mxu0 %v1431_v19  ;;  %744 = vmatmul.mubr.bf16.vlgmr.msra.gmra.mxu1 %v1434_v20 }
  0x4d   : > { %647 = vmatprep.mubr.bf16.mxu0 %v1437_v21  ;;  %751 = vmatprep.mubr.bf16.mxu1 %v1440_v22 }
  0x54   : > { %648 = vmatmul.mubr.bf16.gmra.mxu0 %v1439_v23  ;;  %752 = vmatmul.mubr.bf16.gmra.mxu1 %v1442_v24 }
  0x55   : > { %655 = vmatprep.mubr.bf16.mxu0 %v1443_v25  ;;  %759 = vmatprep.mubr.bf16.mxu1 %v1446_v26 }
  0x5c   : > { %656 = vmatmul.mubr.bf16.gmra.mxu0 %v1445_v27  ;;  %760 = vmatmul.mubr.bf16.gmra.mxu1 %v1448_v28 }
  0x5d   : > { %663 = vmatprep.mubr.bf16.mxu0 %v1449_v29  ;;  %767 = vmatprep.mubr.bf16.mxu1 %v1452_v30 }
  0x64   : > { %664 = vmatmul.mubr.bf16.gmra.mxu0 %v1451_v31  ;;  %768 = vmatmul.mubr.bf16.gmra.mxu1 %v1454_v32 }
  0x65   : > { %671 = vmatprep.mubr.bf16.mxu0 %v1455_v33  ;;  %775 = vmatprep.mubr.bf16.mxu1 %v1458_v34 }
  0x6c   : > { %672 = vmatmul.mubr.bf16.gmra.mxu0 %v1457_v35  ;;  %776 = vmatmul.mubr.bf16.gmra.mxu1 %v1460_v36 }
  0x6d   : > { %679 = vmatprep.mubr.bf16.mxu0 %v1461_v37  ;;  %783 = vmatprep.mubr.bf16.mxu1 %v1464_v38 }
  0x74   : > { %680 = vmatmul.mubr.bf16.gmra.mxu0 %v1463_v39  ;;  %784 = vmatmul.mubr.bf16.gmra.mxu1 %v1466_v40 }
  0x75   : > { %687 = vmatprep.mubr.bf16.mxu0 %v1467_v41  ;;  %791 = vmatprep.mubr.bf16.mxu1 %v1470_v42 }
  0x7c   : > { %688 = vmatmul.mubr.bf16.gmra.mxu0 %v1469_v43  ;;  %792 = vmatmul.mubr.bf16.gmra.mxu1 %v1472_v44 }
  0x7d   : > { %695 = vmatprep.mubr.bf16.mxu0 %v1473_v45  ;;  %799 = vmatprep.mubr.bf16.mxu1 %v1476_v46 }
  0x84   : > { %696 = vmatmul.mubr.bf16.gmra.mxu0 %v1475_v47  ;;  %800 = vmatmul.mubr.bf16.gmra.mxu1 %v1478_v48 }
  0x85   : > { %703 = vmatprep.mubr.bf16.mxu0 %v1479_v49  ;;  %807 = vmatprep.mubr.bf16.mxu1 %v1482_v50 }
  0x8c   : > { %704 = vmatmul.mubr.bf16.gmra.mxu0 %v1481_v51  ;;  %808 = vmatmul.mubr.bf16.gmra.mxu1 %v1484_v52 }
  0x8d   : > { %711 = vmatprep.mubr.bf16.mxu0 %v1485_v53  ;;  %815 = vmatprep.mubr.bf16.mxu1 %v1488_v54 }
  0x94   : > { %712 = vmatmul.mubr.bf16.gmra.mxu0 %v1487_v55  ;;  %816 = vmatmul.mubr.bf16.gmra.mxu1 %v1490_v56 }
  0x95   : > { %719 = vmatprep.mubr.bf16.mxu0 %v1491_v57  ;;  %823 = vmatprep.mubr.bf16.mxu1 %v1494_v58 }
  0x9c   : > { %720 = vmatmul.mubr.bf16.gmra.mxu0 %v1493_v59  ;;  %824 = vmatmul.mubr.bf16.gmra.mxu1 %v1496_v60 }
  0x9d   : > { %727 = vmatprep.mubr.bf16.mxu0 %v1497_v61  ;;  %831 = vmatprep.mubr.bf16.mxu1 %v1500_v62 }
  0xa4   : > { %728 = vmatmul.mubr.bf16.gmra.mxu0 %v1499_v63  ;;  %832 = vmatmul.mubr.bf16.gmra.mxu1 %v1502_v0 }
  0xa5   : > { %735 = vmatprep.mubr.bf16.mxu0 %v1503_v1 }
  0xac   : > { %736 = vmatmul.mubr.bf16.gmra.mxu0 %v1505_v2 }
 0x10c   : > { %v641_v4 = vpop.f32.mrf.mxu0  ;;  %v745_v5 = vpop.f32.mrf.mxu1 }
 0x10d   : > { %v642_v6 = vadd.f32 %v1684_v3, %v641_v4  ;;  %v746_v7 = vadd.f32 %v1684_v3, %v745_v5 }
 0x10e   : > { %v643_v8 = vpop.f32.mrf.mxu0  ;;  %v747_v9 = vpop.f32.mrf.mxu1 }
 0x10f   : > { %v840_v10 = vmax.f32 %v642_v6, 0.0  ;;  %v866_v11 = vmax.f32 %v746_v7, 0.0 }
 0x110   : > { %v644_v12 = vpop.f32.mrf.mxu0  ;;  %v748_v13 = vpop.f32.mrf.mxu1 }
 0x111   : > { %v1322_v14 = vpack.c.bf16 %v840_v10, %v840_v10  ;;  %v1348_v15 = vpack.c.bf16 %v866_v11, %v866_v11  ;;  %v645_v16 = vadd.f32 %v1684_v3, %v644_v12  ;;  %v749_v17 = vadd.f32 %v1684_v3, %v748_v13 }
 0x112   : > { %v646_v18 = vpop.f32.mrf.mxu0  ;;  %v750_v19 = vpop.f32.mrf.mxu1 }
 0x113   : > { %1091 = vst.msk [vmem:[%s1692_s27] sm:$0xf] %vm1090_vm0, %v1322_v14  ;;  %1117 = vst.msk [vmem:[%s1692_s27 + $0x68] sm:$0xf] %vm1090_vm0, %v1348_v15  ;;  %v841_v20 = vmax.f32 %v645_v16, 0.0  ;;  %v867_v21 = vmax.f32 %v749_v17, 0.0 }
 0x114   : > { %v649_v22 = vpop.f32.mrf.mxu0  ;;  %v753_v23 = vpop.f32.mrf.mxu1 }
 0x115   : > { %v1323_v24 = vpack.c.bf16 %v841_v20, %v841_v20  ;;  %v1349_v25 = vpack.c.bf16 %v867_v21, %v867_v21  ;;  %v650_v26 = vadd.f32 %v1684_v3, %v649_v22  ;;  %v754_v27 = vadd.f32 %v1684_v3, %v753_v23 }
 0x116   : > { %v651_v28 = vpop.f32.mrf.mxu0  ;;  %v755_v29 = vpop.f32.mrf.mxu1 }
 0x117   : > { %1092 = vst.msk [vmem:[%s1692_s27 + $0x4] sm:$0xf] %vm1090_vm0, %v1323_v24  ;;  %1118 = vst.msk [vmem:[%s1692_s27 + $0x6c] sm:$0xf] %vm1090_vm0, %v1349_v25  ;;  %v842_v30 = vmax.f32 %v650_v26, 0.0  ;;  %v868_v31 = vmax.f32 %v754_v27, 0.0 }
 0x118   : > { %v652_v32 = vpop.f32.mrf.mxu0  ;;  %v756_v33 = vpop.f32.mrf.mxu1 }
 0x119   : > { %v1324_v34 = vpack.c.bf16 %v842_v30, %v842_v30  ;;  %v1350_v35 = vpack.c.bf16 %v868_v31, %v868_v31  ;;  %v653_v36 = vadd.f32 %v1684_v3, %v652_v32  ;;  %v757_v37 = vadd.f32 %v1684_v3, %v756_v33 }
 0x11a   : > { %v654_v38 = vpop.f32.mrf.mxu0  ;;  %v758_v39 = vpop.f32.mrf.mxu1 }
 0x11b   : > { %1093 = vst.msk [vmem:[%s1692_s27 + $0x8] sm:$0xf] %vm1090_vm0, %v1324_v34  ;;  %1119 = vst.msk [vmem:[%s1692_s27 + $0x70] sm:$0xf] %vm1090_vm0, %v1350_v35  ;;  %v843_v40 = vmax.f32 %v653_v36, 0.0  ;;  %v869_v41 = vmax.f32 %v757_v37, 0.0 }
 0x11c   : > { %v657_v42 = vpop.f32.mrf.mxu0  ;;  %v761_v43 = vpop.f32.mrf.mxu1 }
 0x11d   : > { %v1325_v44 = vpack.c.bf16 %v843_v40, %v843_v40  ;;  %v1351_v45 = vpack.c.bf16 %v869_v41, %v869_v41  ;;  %v658_v46 = vadd.f32 %v1684_v3, %v657_v42  ;;  %v762_v47 = vadd.f32 %v1684_v3, %v761_v43 }
 0x11e   : > { %v659_v48 = vpop.f32.mrf.mxu0  ;;  %v763_v49 = vpop.f32.mrf.mxu1 }
 0x11f   : > { %1094 = vst.msk [vmem:[%s1692_s27 + $0xc] sm:$0xf] %vm1090_vm0, %v1325_v44  ;;  %1120 = vst.msk [vmem:[%s1692_s27 + $0x74] sm:$0xf] %vm1090_vm0, %v1351_v45  ;;  %v844_v50 = vmax.f32 %v658_v46, 0.0  ;;  %v870_v51 = vmax.f32 %v762_v47, 0.0 }
 0x120   : > { %v660_v52 = vpop.f32.mrf.mxu0  ;;  %v764_v53 = vpop.f32.mrf.mxu1 }
 0x121   : > { %v1326_v54 = vpack.c.bf16 %v844_v50, %v844_v50  ;;  %v1352_v55 = vpack.c.bf16 %v870_v51, %v870_v51  ;;  %v661_v56 = vadd.f32 %v1684_v3, %v660_v52  ;;  %v765_v57 = vadd.f32 %v1684_v3, %v764_v53 }
 0x122   : > { %v662_v58 = vpop.f32.mrf.mxu0  ;;  %v766_v59 = vpop.f32.mrf.mxu1 }
 0x123   : > { %1095 = vst.msk [vmem:[%s1692_s27 + $0x10] sm:$0xf] %vm1090_vm0, %v1326_v54  ;;  %1121 = vst.msk [vmem:[%s1692_s27 + $0x78] sm:$0xf] %vm1090_vm0, %v1352_v55  ;;  %v845_v60 = vmax.f32 %v661_v56, 0.0  ;;  %v871_v61 = vmax.f32 %v765_v57, 0.0 }
 0x124   : > { %v665_v62 = vpop.f32.mrf.mxu0  ;;  %v769_v63 = vpop.f32.mrf.mxu1 }
 0x125   : > { %v1327_v0 = vpack.c.bf16 %v845_v60, %v845_v60  ;;  %v1353_v1 = vpack.c.bf16 %v871_v61, %v871_v61  ;;  %v666_v2 = vadd.f32 %v1684_v3, %v665_v62  ;;  %v770_v4 = vadd.f32 %v1684_v3, %v769_v63 }
 0x126   : > { %v667_v5 = vpop.f32.mrf.mxu0  ;;  %v771_v6 = vpop.f32.mrf.mxu1 }
 0x127   : > { %1096 = vst.msk [vmem:[%s1692_s27 + $0x14] sm:$0xf] %vm1090_vm0, %v1327_v0  ;;  %1122 = vst.msk [vmem:[%s1692_s27 + $0x7c] sm:$0xf] %vm1090_vm0, %v1353_v1  ;;  %v846_v7 = vmax.f32 %v666_v2, 0.0  ;;  %v872_v8 = vmax.f32 %v770_v4, 0.0 }
 0x128   : > { %v668_v9 = vpop.f32.mrf.mxu0  ;;  %v772_v10 = vpop.f32.mrf.mxu1 }
 0x129   : > { %v1328_v11 = vpack.c.bf16 %v846_v7, %v846_v7  ;;  %v1354_v12 = vpack.c.bf16 %v872_v8, %v872_v8  ;;  %v669_v13 = vadd.f32 %v1684_v3, %v668_v9  ;;  %v773_v14 = vadd.f32 %v1684_v3, %v772_v10 }
 0x12a   : > { %v670_v15 = vpop.f32.mrf.mxu0  ;;  %v774_v16 = vpop.f32.mrf.mxu1 }
 0x12b   : > { %1097 = vst.msk [vmem:[%s1692_s27 + $0x18] sm:$0xf] %vm1090_vm0, %v1328_v11  ;;  %1123 = vst.msk [vmem:[%s1692_s27 + $0x80] sm:$0xf] %vm1090_vm0, %v1354_v12  ;;  %v847_v17 = vmax.f32 %v669_v13, 0.0  ;;  %v873_v18 = vmax.f32 %v773_v14, 0.0 }
 0x12c   : > { %v673_v19 = vpop.f32.mrf.mxu0  ;;  %v777_v20 = vpop.f32.mrf.mxu1 }
 0x12d   : > { %v1329_v21 = vpack.c.bf16 %v847_v17, %v847_v17  ;;  %v1355_v22 = vpack.c.bf16 %v873_v18, %v873_v18  ;;  %v674_v23 = vadd.f32 %v1684_v3, %v673_v19  ;;  %v778_v24 = vadd.f32 %v1684_v3, %v777_v20 }
 0x12e   : > { %v675_v25 = vpop.f32.mrf.mxu0  ;;  %v779_v26 = vpop.f32.mrf.mxu1 }
 0x12f   : > { %1098 = vst.msk [vmem:[%s1692_s27 + $0x1c] sm:$0xf] %vm1090_vm0, %v1329_v21  ;;  %1124 = vst.msk [vmem:[%s1692_s27 + $0x84] sm:$0xf] %vm1090_vm0, %v1355_v22  ;;  %v848_v27 = vmax.f32 %v674_v23, 0.0  ;;  %v874_v28 = vmax.f32 %v778_v24, 0.0 }
 0x130   : > { %v676_v29 = vpop.f32.mrf.mxu0  ;;  %v780_v30 = vpop.f32.mrf.mxu1 }
 0x131   : > { %v1330_v31 = vpack.c.bf16 %v848_v27, %v848_v27  ;;  %v1356_v32 = vpack.c.bf16 %v874_v28, %v874_v28  ;;  %v677_v33 = vadd.f32 %v1684_v3, %v676_v29  ;;  %v781_v34 = vadd.f32 %v1684_v3, %v780_v30 }
 0x132   : > { %v678_v35 = vpop.f32.mrf.mxu0  ;;  %v782_v36 = vpop.f32.mrf.mxu1 }
 0x133   : > { %1099 = vst.msk [vmem:[%s1692_s27 + $0x20] sm:$0xf] %vm1090_vm0, %v1330_v31  ;;  %1125 = vst.msk [vmem:[%s1692_s27 + $0x88] sm:$0xf] %vm1090_vm0, %v1356_v32  ;;  %v849_v37 = vmax.f32 %v677_v33, 0.0  ;;  %v875_v38 = vmax.f32 %v781_v34, 0.0 }
 0x134   : > { %v681_v39 = vpop.f32.mrf.mxu0  ;;  %v785_v40 = vpop.f32.mrf.mxu1 }
 0x135   : > { %v1331_v41 = vpack.c.bf16 %v849_v37, %v849_v37  ;;  %v1357_v42 = vpack.c.bf16 %v875_v38, %v875_v38  ;;  %v682_v43 = vadd.f32 %v1684_v3, %v681_v39  ;;  %v786_v44 = vadd.f32 %v1684_v3, %v785_v40 }
 0x136   : > { %v683_v45 = vpop.f32.mrf.mxu0  ;;  %v787_v46 = vpop.f32.mrf.mxu1 }
 0x137   : > { %1100 = vst.msk [vmem:[%s1692_s27 + $0x24] sm:$0xf] %vm1090_vm0, %v1331_v41  ;;  %1126 = vst.msk [vmem:[%s1692_s27 + $0x8c] sm:$0xf] %vm1090_vm0, %v1357_v42  ;;  %v850_v47 = vmax.f32 %v682_v43, 0.0  ;;  %v876_v48 = vmax.f32 %v786_v44, 0.0 }
 0x138   : > { %v684_v49 = vpop.f32.mrf.mxu0  ;;  %v788_v50 = vpop.f32.mrf.mxu1 }
 0x139   : > { %v1332_v51 = vpack.c.bf16 %v850_v47, %v850_v47  ;;  %v1358_v52 = vpack.c.bf16 %v876_v48, %v876_v48  ;;  %v685_v53 = vadd.f32 %v1684_v3, %v684_v49  ;;  %v789_v54 = vadd.f32 %v1684_v3, %v788_v50 }
 0x13a   : > { %v686_v55 = vpop.f32.mrf.mxu0  ;;  %v790_v56 = vpop.f32.mrf.mxu1 }
 0x13b   : > { %1101 = vst.msk [vmem:[%s1692_s27 + $0x28] sm:$0xf] %vm1090_vm0, %v1332_v51  ;;  %1127 = vst.msk [vmem:[%s1692_s27 + $0x90] sm:$0xf] %vm1090_vm0, %v1358_v52  ;;  %v851_v57 = vmax.f32 %v685_v53, 0.0  ;;  %v877_v58 = vmax.f32 %v789_v54, 0.0 }
 0x13c   : > { %v689_v59 = vpop.f32.mrf.mxu0  ;;  %v793_v60 = vpop.f32.mrf.mxu1 }
 0x13d   : > { %v1333_v61 = vpack.c.bf16 %v851_v57, %v851_v57  ;;  %v1359_v62 = vpack.c.bf16 %v877_v58, %v877_v58  ;;  %v690_v63 = vadd.f32 %v1684_v3, %v689_v59  ;;  %v794_v0 = vadd.f32 %v1684_v3, %v793_v60 }
 0x13e   : > { %v691_v1 = vpop.f32.mrf.mxu0  ;;  %v795_v2 = vpop.f32.mrf.mxu1 }
 0x13f   : > { %1102 = vst.msk [vmem:[%s1692_s27 + $0x2c] sm:$0xf] %vm1090_vm0, %v1333_v61  ;;  %1128 = vst.msk [vmem:[%s1692_s27 + $0x94] sm:$0xf] %vm1090_vm0, %v1359_v62  ;;  %v852_v4 = vmax.f32 %v690_v63, 0.0  ;;  %v878_v5 = vmax.f32 %v794_v0, 0.0 }
 0x140   : > { %v692_v6 = vpop.f32.mrf.mxu0  ;;  %v796_v7 = vpop.f32.mrf.mxu1 }
 0x141   : > { %v1334_v8 = vpack.c.bf16 %v852_v4, %v852_v4  ;;  %v1360_v9 = vpack.c.bf16 %v878_v5, %v878_v5  ;;  %v693_v10 = vadd.f32 %v1684_v3, %v692_v6  ;;  %v797_v11 = vadd.f32 %v1684_v3, %v796_v7 }
 0x142   : > { %v694_v12 = vpop.f32.mrf.mxu0  ;;  %v798_v13 = vpop.f32.mrf.mxu1 }
 0x143   : > { %1103 = vst.msk [vmem:[%s1692_s27 + $0x30] sm:$0xf] %vm1090_vm0, %v1334_v8  ;;  %1129 = vst.msk [vmem:[%s1692_s27 + $0x98] sm:$0xf] %vm1090_vm0, %v1360_v9  ;;  %v853_v14 = vmax.f32 %v693_v10, 0.0  ;;  %v879_v15 = vmax.f32 %v797_v11, 0.0 }
 0x144   : > { %v697_v16 = vpop.f32.mrf.mxu0  ;;  %v801_v17 = vpop.f32.mrf.mxu1 }
 0x145   : > { %v1335_v18 = vpack.c.bf16 %v853_v14, %v853_v14  ;;  %v1361_v19 = vpack.c.bf16 %v879_v15, %v879_v15  ;;  %v698_v20 = vadd.f32 %v1684_v3, %v697_v16  ;;  %v802_v21 = vadd.f32 %v1684_v3, %v801_v17 }
 0x146   : > { %v699_v22 = vpop.f32.mrf.mxu0  ;;  %v803_v23 = vpop.f32.mrf.mxu1 }
 0x147   : > { %1104 = vst.msk [vmem:[%s1692_s27 + $0x34] sm:$0xf] %vm1090_vm0, %v1335_v18  ;;  %1130 = vst.msk [vmem:[%s1692_s27 + $0x9c] sm:$0xf] %vm1090_vm0, %v1361_v19  ;;  %v854_v24 = vmax.f32 %v698_v20, 0.0  ;;  %v880_v25 = vmax.f32 %v802_v21, 0.0 }
 0x148   : > { %v700_v26 = vpop.f32.mrf.mxu0  ;;  %v804_v27 = vpop.f32.mrf.mxu1 }
 0x149   : > { %v1336_v28 = vpack.c.bf16 %v854_v24, %v854_v24  ;;  %v1362_v29 = vpack.c.bf16 %v880_v25, %v880_v25  ;;  %v701_v30 = vadd.f32 %v1684_v3, %v700_v26  ;;  %v805_v31 = vadd.f32 %v1684_v3, %v804_v27 }
 0x14a   : > { %v702_v32 = vpop.f32.mrf.mxu0  ;;  %v806_v33 = vpop.f32.mrf.mxu1 }
 0x14b   : > { %1105 = vst.msk [vmem:[%s1692_s27 + $0x38] sm:$0xf] %vm1090_vm0, %v1336_v28  ;;  %1131 = vst.msk [vmem:[%s1692_s27 + $0xa0] sm:$0xf] %vm1090_vm0, %v1362_v29  ;;  %v855_v34 = vmax.f32 %v701_v30, 0.0  ;;  %v881_v35 = vmax.f32 %v805_v31, 0.0 }
 0x14c   : > { %v705_v36 = vpop.f32.mrf.mxu0  ;;  %v809_v37 = vpop.f32.mrf.mxu1 }
 0x14d   : > { %v1337_v38 = vpack.c.bf16 %v855_v34, %v855_v34  ;;  %v1363_v39 = vpack.c.bf16 %v881_v35, %v881_v35  ;;  %v706_v40 = vadd.f32 %v1684_v3, %v705_v36  ;;  %v810_v41 = vadd.f32 %v1684_v3, %v809_v37 }
 0x14e   : > { %v707_v42 = vpop.f32.mrf.mxu0  ;;  %v811_v43 = vpop.f32.mrf.mxu1 }
 0x14f   : > { %1106 = vst.msk [vmem:[%s1692_s27 + $0x3c] sm:$0xf] %vm1090_vm0, %v1337_v38  ;;  %1132 = vst.msk [vmem:[%s1692_s27 + $0xa4] sm:$0xf] %vm1090_vm0, %v1363_v39  ;;  %v856_v44 = vmax.f32 %v706_v40, 0.0  ;;  %v882_v45 = vmax.f32 %v810_v41, 0.0 }
 0x150   : > { %v708_v46 = vpop.f32.mrf.mxu0  ;;  %v812_v47 = vpop.f32.mrf.mxu1 }
 0x151   : > { %v1338_v48 = vpack.c.bf16 %v856_v44, %v856_v44  ;;  %v1364_v49 = vpack.c.bf16 %v882_v45, %v882_v45  ;;  %v709_v50 = vadd.f32 %v1684_v3, %v708_v46  ;;  %v813_v51 = vadd.f32 %v1684_v3, %v812_v47 }
 0x152   : > { %v710_v52 = vpop.f32.mrf.mxu0  ;;  %v814_v53 = vpop.f32.mrf.mxu1 }
 0x153   : > { %1107 = vst.msk [vmem:[%s1692_s27 + $0x40] sm:$0xf] %vm1090_vm0, %v1338_v48  ;;  %1133 = vst.msk [vmem:[%s1692_s27 + $0xa8] sm:$0xf] %vm1090_vm0, %v1364_v49  ;;  %v857_v54 = vmax.f32 %v709_v50, 0.0  ;;  %v883_v55 = vmax.f32 %v813_v51, 0.0 }
 0x154   : > { %v713_v56 = vpop.f32.mrf.mxu0  ;;  %v817_v57 = vpop.f32.mrf.mxu1 }
 0x155   : > { %v1339_v58 = vpack.c.bf16 %v857_v54, %v857_v54  ;;  %v1365_v59 = vpack.c.bf16 %v883_v55, %v883_v55  ;;  %v714_v60 = vadd.f32 %v1684_v3, %v713_v56  ;;  %v818_v61 = vadd.f32 %v1684_v3, %v817_v57 }
 0x156   : > { %v715_v62 = vpop.f32.mrf.mxu0  ;;  %v819_v63 = vpop.f32.mrf.mxu1 }
 0x157   : > { %1108 = vst.msk [vmem:[%s1692_s27 + $0x44] sm:$0xf] %vm1090_vm0, %v1339_v58  ;;  %1134 = vst.msk [vmem:[%s1692_s27 + $0xac] sm:$0xf] %vm1090_vm0, %v1365_v59  ;;  %v858_v0 = vmax.f32 %v714_v60, 0.0  ;;  %v884_v1 = vmax.f32 %v818_v61, 0.0 }
 0x158   : > { %v716_v2 = vpop.f32.mrf.mxu0  ;;  %v820_v4 = vpop.f32.mrf.mxu1 }
 0x159   : > { %v1340_v5 = vpack.c.bf16 %v858_v0, %v858_v0  ;;  %v1366_v6 = vpack.c.bf16 %v884_v1, %v884_v1  ;;  %v717_v7 = vadd.f32 %v1684_v3, %v716_v2  ;;  %v821_v8 = vadd.f32 %v1684_v3, %v820_v4 }
 0x15a   : > { %v718_v9 = vpop.f32.mrf.mxu0  ;;  %v822_v10 = vpop.f32.mrf.mxu1 }
 0x15b   : > { %1109 = vst.msk [vmem:[%s1692_s27 + $0x48] sm:$0xf] %vm1090_vm0, %v1340_v5  ;;  %1135 = vst.msk [vmem:[%s1692_s27 + $0xb0] sm:$0xf] %vm1090_vm0, %v1366_v6  ;;  %v859_v11 = vmax.f32 %v717_v7, 0.0  ;;  %v885_v12 = vmax.f32 %v821_v8, 0.0 }
 0x15c   : > { %v721_v13 = vpop.f32.mrf.mxu0  ;;  %v825_v14 = vpop.f32.mrf.mxu1 }
 0x15d   : > { %v1341_v15 = vpack.c.bf16 %v859_v11, %v859_v11  ;;  %v1367_v16 = vpack.c.bf16 %v885_v12, %v885_v12  ;;  %v722_v17 = vadd.f32 %v1684_v3, %v721_v13  ;;  %v826_v18 = vadd.f32 %v1684_v3, %v825_v14 }
 0x15e   : > { %v723_v19 = vpop.f32.mrf.mxu0  ;;  %v827_v20 = vpop.f32.mrf.mxu1 }
 0x15f   : > { %1110 = vst.msk [vmem:[%s1692_s27 + $0x4c] sm:$0xf] %vm1090_vm0, %v1341_v15  ;;  %1136 = vst.msk [vmem:[%s1692_s27 + $0xb4] sm:$0xf] %vm1090_vm0, %v1367_v16  ;;  %v860_v21 = vmax.f32 %v722_v17, 0.0  ;;  %v886_v22 = vmax.f32 %v826_v18, 0.0 }
 0x160   : > { %v724_v23 = vpop.f32.mrf.mxu0  ;;  %v828_v24 = vpop.f32.mrf.mxu1 }
 0x161   : > { %v1342_v25 = vpack.c.bf16 %v860_v21, %v860_v21  ;;  %v1368_v26 = vpack.c.bf16 %v886_v22, %v886_v22  ;;  %v725_v27 = vadd.f32 %v1684_v3, %v724_v23  ;;  %v829_v28 = vadd.f32 %v1684_v3, %v828_v24 }
 0x162   : > { %v726_v29 = vpop.f32.mrf.mxu0  ;;  %v830_v30 = vpop.f32.mrf.mxu1 }
 0x163   : > { %1111 = vst.msk [vmem:[%s1692_s27 + $0x50] sm:$0xf] %vm1090_vm0, %v1342_v25  ;;  %1137 = vst.msk [vmem:[%s1692_s27 + $0xb8] sm:$0xf] %vm1090_vm0, %v1368_v26  ;;  %v861_v31 = vmax.f32 %v725_v27, 0.0  ;;  %v887_v32 = vmax.f32 %v829_v28, 0.0 }
 0x164   : > { %v729_v33 = vpop.f32.mrf.mxu0  ;;  %v833_v34 = vpop.f32.mrf.mxu1 }
 0x165   : > { %v1343_v35 = vpack.c.bf16 %v861_v31, %v861_v31  ;;  %v1369_v36 = vpack.c.bf16 %v887_v32, %v887_v32  ;;  %v730_v37 = vadd.f32 %v1684_v3, %v729_v33  ;;  %v834_v38 = vadd.f32 %v1684_v3, %v833_v34 }
 0x166   : > { %v731_v39 = vpop.f32.mrf.mxu0  ;;  %v835_v40 = vpop.f32.mrf.mxu1 }
 0x167   : > { %1112 = vst.msk [vmem:[%s1692_s27 + $0x54] sm:$0xf] %vm1090_vm0, %v1343_v35  ;;  %1138 = vst.msk [vmem:[%s1692_s27 + $0xbc] sm:$0xf] %vm1090_vm0, %v1369_v36  ;;  %v862_v41 = vmax.f32 %v730_v37, 0.0  ;;  %v888_v42 = vmax.f32 %v834_v38, 0.0 }
 0x168   : > { %v732_v43 = vpop.f32.mrf.mxu0  ;;  %v836_v44 = vpop.f32.mrf.mxu1 }
 0x169   : > { %v1344_v45 = vpack.c.bf16 %v862_v41, %v862_v41  ;;  %v1370_v46 = vpack.c.bf16 %v888_v42, %v888_v42  ;;  %v733_v47 = vadd.f32 %v1684_v3, %v732_v43  ;;  %v837_v48 = vadd.f32 %v1684_v3, %v836_v44 }
 0x16a   : > { %v734_v49 = vpop.f32.mrf.mxu0  ;;  %v838_v50 = vpop.f32.mrf.mxu1 }
 0x16b   : > { %1113 = vst.msk [vmem:[%s1692_s27 + $0x58] sm:$0xf] %vm1090_vm0, %v1344_v45  ;;  %1139 = vst.msk [vmem:[%s1692_s27 + $0xc0] sm:$0xf] %vm1090_vm0, %v1370_v46  ;;  %v863_v51 = vmax.f32 %v733_v47, 0.0  ;;  %v889_v52 = vmax.f32 %v837_v48, 0.0 }
 0x16c   : > { %v737_v53 = vpop.f32.mrf.mxu0 }
 0x16d   : > { %v1345_v54 = vpack.c.bf16 %v863_v51, %v863_v51  ;;  %v1371_v55 = vpack.c.bf16 %v889_v52, %v889_v52  ;;  %v738_v56 = vadd.f32 %v1684_v3, %v737_v53 }
 0x16e   : > { %v739_v57 = vpop.f32.mrf.mxu0 }
 0x16f   : > { %1114 = vst.msk [vmem:[%s1692_s27 + $0x5c] sm:$0xf] %vm1090_vm0, %v1345_v54  ;;  %1140 = vst.msk [vmem:[%s1692_s27 + $0xc4] sm:$0xf] %vm1090_vm0, %v1371_v55  ;;  %v864_v58 = vmax.f32 %v738_v56, 0.0 }
 0x170   : > { %v740_v59 = vpop.f32.mrf.mxu0 }
 0x171   : > { %v1346_v60 = vpack.c.bf16 %v864_v58, %v864_v58  ;;  %v741_v61 = vadd.f32 %v1684_v3, %v740_v59 }
 0x172   : > { %v742_v62 = vpop.f32.mrf.mxu0 }
 0x173   : > { %1115 = vst.msk [vmem:[%s1692_s27 + $0x60] sm:$0xf] %vm1090_vm0, %v1346_v60  ;;  %v865_v63 = vmax.f32 %v741_v61, 0.0 }
 0x175   : > { %v1347_v0 = vpack.c.bf16 %v865_v63, %v865_v63 }
 0x177   : > { %1116 = vst.msk [vmem:[%s1692_s27 + $0x64] sm:$0xf] %vm1090_vm0, %v1347_v0 }
 0x178 PF: > { %s13_s12 = sadd.s32 1, %s1512_s12  }
 0x179   : > { %p10_p4 = scmp.ge.s32.totalorder %s13_s12, 4  }
 0x17b   :  { %12 = sbr.rel (!%p10_p4) target bundleno = 1 (0x1), region = 62 }

// kernel: dqn_forward.5
= control target key start
LH: loop header
LB: loop body
LE: loop exit
PB: predicated region body
PF: predicated region fallthrough
CT: control target
= control target key end

     0   :  { %s1155_s12 = smov 0   ;;  %s1340_s0 = inlined_call_operand.vmem [shape: bf16[2,81,512], index: 0, kind: input, shape index: {}]   ;;  %s1341_s1 = inlined_call_operand.vmem [shape: bf16[512,64], index: 1, kind: input, shape index: {}]   ;;  %s1342_s2 = inlined_call_operand.vmem [shape: f32[1,64], index: 2, kind: input, shape index: {}]   ;;  %s1343_s3 = inlined_call_operand.vmem [shape: bf16[2,81,64], index: 3, kind: output, shape index: {}]  }
   0x1 LB: > { %s859_s13 = sadd.s32 4294967295, %s1133_s12   ;;  %p863_p0 = scmp.ge.s32.totalorder %s1133_s12, 1  ;;  %s1133_s12 = sphi %s1155_s12, %s13_s12  }
   0x2   : > { %p137_p1 = scmp.lt.s32.totalorder %s1133_s12, 3 }
   0x4   : > { %p138_p2 = pnand %p863_p0, %p137_p1 }
   0x5   : > { %p161_p3 = scmp.lt.s32.totalorder (!%p138_p2), %s859_s13, 1 }
   0x6   : > { %141 = sbr.rel (%p138_p2) target bundleno = 292 (0x124), region = 32 }
   0xb   : > { %v1061_v0 = vld [vmem:[%s1341_s1 + $0x78] sm:$0xff]   ;;  %v1065_v4 = vld [vmem:[%s1341_s1 + $0x70] sm:$0xff]   ;;  %v1069_v8 = vld [vmem:[%s1341_s1 + $0x68] sm:$0xff]   ;;  %s1345_s13 = smov (!%p161_p3, %s859_s13), 1  ;;  %vm787_vm0 = vcmask 519168   ;;  %vm798_vm1 = vcmask 516096  }
   0xc   : > { %v1062_v1 = vld [vmem:[%s1341_s1 + $0xf8] sm:$0xff]   ;;  %947 = vmatprep.subr.bf16.mxu0 %v1061_v0  ;;  %v1066_v5 = vld [vmem:[%s1341_s1 + $0xf0] sm:$0xff]   ;;  %v1070_v9 = vld [vmem:[%s1341_s1 + $0xe8] sm:$0xff]   ;;  %s1051_s16 = smul.u32 176, %s1345_s13  ;;  %vm799_vm2 = vsmask.f32 256 }
   0xd   : > { %v1063_v2 = vld [vmem:[%s1341_s1 + $0x38] sm:$0xff]   ;;  %999 = vmatprep.subr.bf16.mxu1 %v1062_v1  ;;  %v1067_v6 = vld [vmem:[%s1341_s1 + $0x30] sm:$0xff]   ;;  %v1071_v10 = vld [vmem:[%s1341_s1 + $0x28] sm:$0xff]   ;;  %s1052_s7 = smul.u32 44, %s1345_s13 }
   0xe   : > { %v1064_v3 = vld [vmem:[%s1341_s1 + $0xb8] sm:$0xff]   ;;  %948 = vmatpush3.bf16.msra.mxu0 %v1063_v2  ;;  %v1068_v7 = vld [vmem:[%s1341_s1 + $0xb0] sm:$0xff]   ;;  %v1072_v11 = vld [vmem:[%s1341_s1 + $0xa8] sm:$0xff]   ;;  %s1263_s27 = scalar_lea.vmem %s1340_s0, %s1051_s16 }
   0xf   : > { %1000 = vmatpush3.bf16.msra.mxu1 %v1064_v3  ;;  %949 = vmatprep.subr.bf16.mxu0 %v1065_v4  ;;  %v1073_v12 = vld [vmem:[%s1341_s1 + $0x60] sm:$0xff]   ;;  %v1077_v16 = vld [vmem:[%s1341_s1 + $0x58] sm:$0xff]   ;;  %v1081_v20 = vld [vmem:[%s1341_s1 + $0x50] sm:$0xff]   ;;  %s1304_s10 = scalar_lea.vmem %s1343_s3, %s1052_s7 }
  0x10   : > { %1001 = vmatprep.subr.bf16.mxu1 %v1066_v5  ;;  %v1074_v13 = vld [vmem:[%s1341_s1 + $0xe0] sm:$0xff]   ;;  %v1078_v17 = vld [vmem:[%s1341_s1 + $0xd8] sm:$0xff]   ;;  %v1082_v21 = vld [vmem:[%s1341_s1 + $0xd0] sm:$0xff]  }
  0x11   : > { %v1075_v14 = vld [vmem:[%s1341_s1 + $0x20] sm:$0xff]   ;;  %v1079_v18 = vld [vmem:[%s1341_s1 + $0x18] sm:$0xff]   ;;  %v1083_v22 = vld [vmem:[%s1341_s1 + $0x10] sm:$0xff]  }
  0x12   : > { %950 = vmatpush3.bf16.msra.mxu0 %v1067_v6  ;;  %v1076_v15 = vld [vmem:[%s1341_s1 + $0xa0] sm:$0xff]   ;;  %v1080_v19 = vld [vmem:[%s1341_s1 + $0x98] sm:$0xff]   ;;  %v1084_v23 = vld [vmem:[%s1341_s1 + $0x90] sm:$0xff]  }
  0x13   : > { %1002 = vmatpush3.bf16.msra.mxu1 %v1068_v7  ;;  %951 = vmatprep.subr.bf16.mxu0 %v1069_v8  ;;  %v1085_v24 = vld [vmem:[%s1341_s1 + $0x48] sm:$0xff]   ;;  %v1089_v28 = vld [vmem:[%s1341_s1 + $0x40] sm:$0xff]   ;;  %vm800_vm3 = vmand %vm798_vm1, %vm799_vm2 }
  0x14   : > { %1003 = vmatprep.subr.bf16.mxu1 %v1070_v9  ;;  %v1086_v25 = vld [vmem:[%s1341_s1 + $0xc8] sm:$0xff]   ;;  %v1090_v29 = vld [vmem:[%s1341_s1 + $0xc0] sm:$0xff]  }
  0x15   : > { %v1087_v26 = vld [vmem:[%s1341_s1 + $0x8] sm:$0xff]   ;;  %v1091_v30 = vld [vmem:[%s1341_s1] sm:$0xff]  }
  0x16   : > { %952 = vmatpush3.bf16.msra.mxu0 %v1071_v10  ;;  %v1088_v27 = vld [vmem:[%s1341_s1 + $0x88] sm:$0xff]   ;;  %v1092_v31 = vld [vmem:[%s1341_s1 + $0x80] sm:$0xff]  }
  0x17   : > { %1004 = vmatpush3.bf16.msra.mxu1 %v1072_v11  ;;  %953 = vmatprep.subr.bf16.mxu0 %v1073_v12  ;;  %v1093_v32 = vld [vmem:[%s1263_s27] ss:$16 sps:$4 sm:$0xff]   ;;  %v1095_v33 = vld [vmem:[%s1263_s27 + $0x4] ss:$16 sps:$4 sm:$0xff]   ;;  %v1096_v34 = vld [vmem:[%s1263_s27 + $0x8] ss:$16 sps:$4 sm:$0xff]  }
  0x18   : > { %1005 = vmatprep.subr.bf16.mxu1 %v1074_v13  ;;  %v1098_v35 = vld [vmem:[%s1263_s27 + $0xc] ss:$16 sps:$4 sm:$0xff]   ;;  %603 = vmatprep.mubr.bf16.mxu0 %v1095_v33  ;;  %v1099_v36 = vld [vmem:[%s1263_s27 + $0x24] ss:$16 sps:$4 sm:$0xff]   ;;  %v1103_v38 = vld [vmem:[%s1263_s27 + $0x20] ss:$16 sps:$4 sm:$0xff]  }
  0x19   : > { %683 = vmatprep.mubr.bf16.mxu1 %v1098_v35  ;;  %v1101_v37 = vld [vmem:[%s1263_s27 + $0x2c] ss:$16 sps:$4 sm:$0xff]   ;;  %v1104_v39 = vld [vmem:[%s1263_s27 + $0x28] ss:$16 sps:$4 sm:$0xff]   ;;  %v1105_v40 = vld [vmem:[%s1263_s27 + $0x44] ss:$16 sps:$4 sm:$0xff]  }
  0x1a   : > { %954 = vmatpush3.bf16.msra.mxu0 %v1075_v14  ;;  %v1107_v41 = vld [vmem:[%s1263_s27 + $0x4c] ss:$16 sps:$4 sm:$0xff]   ;;  %v1109_v42 = vld [vmem:[%s1263_s27 + $0x40] ss:$16 sps:$4 sm:$0xff]   ;;  %v1110_v43 = vld [vmem:[%s1263_s27 + $0x48] ss:$16 sps:$4 sm:$0xff]  }
  0x1b   : > { %1006 = vmatpush3.bf16.msra.mxu1 %v1076_v15  ;;  %955 = vmatprep.subr.bf16.mxu0 %v1077_v16  ;;  %v1111_v44 = vld [vmem:[%s1263_s27 + $0x64] ss:$16 sps:$4 sm:$0xff]   ;;  %v1113_v45 = vld [vmem:[%s1263_s27 + $0x6c] ss:$16 sps:$4 sm:$0xff]   ;;  %v1115_v46 = vld [vmem:[%s1263_s27 + $0x60] ss:$16 sps:$4 sm:$0xff]  }
  0x1c   : > { %1007 = vmatprep.subr.bf16.mxu1 %v1078_v17  ;;  %v1116_v47 = vld [vmem:[%s1263_s27 + $0x68] ss:$16 sps:$4 sm:$0xff]   ;;  %v1117_v48 = vld [vmem:[%s1263_s27 + $0x84] ss:$16 sps:$4 sm:$0xff]   ;;  %v1119_v49 = vld [vmem:[%s1263_s27 + $0x8c] ss:$16 sps:$4 sm:$0xff]  }
  0x1d   : > { %v192_v50 = vld [vmem:[%s1263_s27 + $0xa0] sm:$0x11]  ;;  %v193_v51 = vld [vmem:[%s1263_s27 + $0xa8] sm:$0x11] }
  0x1e   : > { %956 = vmatpush3.bf16.msra.mxu0 %v1079_v18  ;;  %v1121_v52 = vld [vmem:[%s1263_s27 + $0x80] ss:$16 sps:$4 sm:$0xff]   ;;  %v1122_v53 = vld [vmem:[%s1263_s27 + $0x88] ss:$16 sps:$4 sm:$0xff]   ;;  %v888_v54 = vcombine.high %v192_v50, %v192_v50  ;;  %v890_v55 = vcombine.high %v193_v51, %v193_v51  ;;  %v887_v56 = vcombine.low %v192_v50, %v192_v50  ;;  %v889_v57 = vcombine.low %v193_v51, %v193_v51 }
  0x1f   : > { %1008 = vmatpush3.bf16.msra.mxu1 %v1080_v19  ;;  %957 = vmatprep.subr.bf16.mxu0 %v1081_v20  ;;  %v1296_v60 = vld [vmem:[%s1342_s2] ss:$0 sm:$0xff] }
  0x20   : > { %1009 = vmatprep.subr.bf16.mxu1 %v1082_v21 }
  0x22   : > { %958 = vmatpush3.bf16.msra.mxu0 %v1083_v22 }
  0x23   : > { %1010 = vmatpush3.bf16.msra.mxu1 %v1084_v23  ;;  %959 = vmatprep.subr.bf16.mxu0 %v1085_v24 }
  0x24   : > { %1011 = vmatprep.subr.bf16.mxu1 %v1086_v25 }
  0x26   : > { %960 = vmatpush3.bf16.msra.mxu0 %v1087_v26 }
  0x27   : > { %1012 = vmatpush3.bf16.msra.mxu1 %v1088_v27  ;;  %961 = vmatprep.subr.bf16.mxu0 %v1089_v28 }
  0x28   : > { %1013 = vmatprep.subr.bf16.mxu1 %v1090_v29 }
  0x2a   : > { %962 = vmatpush3.bf16.msra.mxu0 %v1091_v30 }
  0x2b   : > { %1014 = vmatpush3.bf16.msra.mxu1 %v1092_v31 }
  0x2d   : > { %604 = vmatmul.mubr.bf16.vlgmr.msra.gmra.mxu0 %v1093_v32 }
  0x2e   : > { %684 = vmatmul.mubr.bf16.vlgmr.msra.gmra.mxu1 %v1096_v34  ;;  %611 = vmatprep.mubr.bf16.mxu0 %v1099_v36 }
  0x2f   : > { %691 = vmatprep.mubr.bf16.mxu1 %v1101_v37 }
  0x35   : > { %612 = vmatmul.mubr.bf16.gmra.mxu0 %v1103_v38 }
  0x36   : > { %692 = vmatmul.mubr.bf16.gmra.mxu1 %v1104_v39  ;;  %619 = vmatprep.mubr.bf16.mxu0 %v1105_v40 }
  0x37   : > { %699 = vmatprep.mubr.bf16.mxu1 %v1107_v41 }
  0x3d   : > { %620 = vmatmul.mubr.bf16.gmra.mxu0 %v1109_v42 }
  0x3e   : > { %700 = vmatmul.mubr.bf16.gmra.mxu1 %v1110_v43  ;;  %627 = vmatprep.mubr.bf16.mxu0 %v1111_v44 }
  0x3f   : > { %707 = vmatprep.mubr.bf16.mxu1 %v1113_v45 }
  0x45   : > { %628 = vmatmul.mubr.bf16.gmra.mxu0 %v1115_v46 }
  0x46   : > { %708 = vmatmul.mubr.bf16.gmra.mxu1 %v1116_v47  ;;  %635 = vmatprep.mubr.bf16.mxu0 %v1117_v48 }
  0x47   : > { %715 = vmatprep.mubr.bf16.mxu1 %v1119_v49 }
  0x4d   : > { %636 = vmatmul.mubr.bf16.gmra.mxu0 %v1121_v52 }
  0x4e   : > { %716 = vmatmul.mubr.bf16.gmra.mxu1 %v1122_v53  ;;  %643 = vmatprep.mubr.bf16.mxu0 %v888_v54 }
  0x4f   : > { %723 = vmatprep.mubr.bf16.mxu1 %v890_v55 }
  0x55   : > { %644 = vmatmul.mubr.bf16.gmra.mxu0 %v887_v56 }
  0x56   : > { %724 = vmatmul.mubr.bf16.gmra.mxu1 %v889_v57 }
  0xed   : > { %v963_v58 = vpop.f32.mrf.mxu0 }
  0xee   : > { %v1015_v59 = vpop.f32.mrf.mxu1 }
  0xef   : > { %v964_v61 = vpop.f32.mrf.mxu0 }
  0xf0   : > { %v965_v62 = vadd.f32 %v964_v61, %v963_v58  ;;  %v1016_v63 = vpop.f32.mrf.mxu1 }
  0xf1   : > { %v966_v0 = vpop.f32.mrf.mxu0  ;;  %v1017_v2 = vadd.f32 %v1016_v63, %v1015_v59 }
  0xf2   : > { %v606_v1 = vadd.f32 %v965_v62, %v1296_v60  ;;  %v1018_v3 = vpop.f32.mrf.mxu1 }
  0xf3   : > { %v967_v4 = vpop.f32.mrf.mxu0 }
  0xf4   : > { %v686_v5 = vadd.f32 %v1017_v2, %v606_v1  ;;  %v968_v6 = vadd.f32 %v967_v4, %v966_v0  ;;  %v1019_v7 = vpop.f32.mrf.mxu1 }
  0xf5   : > { %v969_v8 = vpop.f32.mrf.mxu0  ;;  %v1020_v11 = vadd.f32 %v1019_v7, %v1018_v3 }
  0xf6   : > { %v731_v9 = vmax.f32 %v686_v5, 0.0  ;;  %v609_v10 = vadd.f32 %v968_v6, %v1296_v60  ;;  %v1021_v12 = vpop.f32.mrf.mxu1 }
  0xf7   : > { %v970_v13 = vpop.f32.mrf.mxu0 }
  0xf8   : > { %v936_v14 = vpack.c.bf16 %v731_v9, %v731_v9  ;;  %v689_v15 = vadd.f32 %v1020_v11, %v609_v10  ;;  %v971_v16 = vadd.f32 %v970_v13, %v969_v8  ;;  %v1022_v17 = vpop.f32.mrf.mxu1 }
  0xf9   : > { %v972_v18 = vpop.f32.mrf.mxu0  ;;  %v1023_v21 = vadd.f32 %v1022_v17, %v1021_v12 }
  0xfa   : > { %788 = vst.msk [vmem:[%s1304_s10] sm:$0xf] %vm787_vm0, %v936_v14  ;;  %v732_v19 = vmax.f32 %v689_v15, 0.0  ;;  %v614_v20 = vadd.f32 %v971_v16, %v1296_v60  ;;  %v1024_v22 = vpop.f32.mrf.mxu1 }
  0xfb   : > { %v973_v23 = vpop.f32.mrf.mxu0 }
  0xfc   : > { %v937_v24 = vpack.c.bf16 %v732_v19, %v732_v19  ;;  %v694_v25 = vadd.f32 %v1023_v21, %v614_v20  ;;  %v974_v26 = vadd.f32 %v973_v23, %v972_v18  ;;  %v1025_v27 = vpop.f32.mrf.mxu1 }
  0xfd   : > { %v975_v28 = vpop.f32.mrf.mxu0  ;;  %v1026_v31 = vadd.f32 %v1025_v27, %v1024_v22 }
  0xfe   : > { %789 = vst.msk [vmem:[%s1304_s10 + $0x4] sm:$0xf] %vm787_vm0, %v937_v24  ;;  %v733_v29 = vmax.f32 %v694_v25, 0.0  ;;  %v617_v30 = vadd.f32 %v974_v26, %v1296_v60  ;;  %v1027_v32 = vpop.f32.mrf.mxu1 }
  0xff   : > { %v976_v33 = vpop.f32.mrf.mxu0 }
 0x100   : > { %v938_v34 = vpack.c.bf16 %v733_v29, %v733_v29  ;;  %v697_v35 = vadd.f32 %v1026_v31, %v617_v30  ;;  %v977_v36 = vadd.f32 %v976_v33, %v975_v28  ;;  %v1028_v37 = vpop.f32.mrf.mxu1 }
 0x101   : > { %v978_v38 = vpop.f32.mrf.mxu0  ;;  %v1029_v41 = vadd.f32 %v1028_v37, %v1027_v32 }
 0x102   : > { %790 = vst.msk [vmem:[%s1304_s10 + $0x8] sm:$0xf] %vm787_vm0, %v938_v34  ;;  %v734_v39 = vmax.f32 %v697_v35, 0.0  ;;  %v622_v40 = vadd.f32 %v977_v36, %v1296_v60  ;;  %v1030_v42 = vpop.f32.mrf.mxu1 }
 0x103   : > { %v979_v43 = vpop.f32.mrf.mxu0 }
 0x104   : > { %v939_v44 = vpack.c.bf16 %v734_v39, %v734_v39  ;;  %v702_v45 = vadd.f32 %v1029_v41, %v622_v40  ;;  %v980_v46 = vadd.f32 %v979_v43, %v978_v38  ;;  %v1031_v47 = vpop.f32.mrf.mxu1 }
 0x105   : > { %v981_v48 = vpop.f32.mrf.mxu0  ;;  %v1032_v51 = vadd.f32 %v1031_v47, %v1030_v42 }
 0x106   : > { %791 = vst.msk [vmem:[%s1304_s10 + $0xc] sm:$0xf] %vm787_vm0, %v939_v44  ;;  %v735_v49 = vmax.f32 %v702_v45, 0.0  ;;  %v625_v50 = vadd.f32 %v980_v46, %v1296_v60  ;;  %v1033_v52 = vpop.f32.mrf.mxu1  ;;  %v801_v45 = vld [vmem:[%s1304_s10 + $0x28] sm:$0x1] }
 0x107   : > { %v982_v53 = vpop.f32.mrf.mxu0 }
 0x108   : > { %v940_v54 = vpack.c.bf16 %v735_v49, %v735_v49  ;;  %v705_v55 = vadd.f32 %v1032_v51, %v625_v50  ;;  %v983_v56 = vadd.f32 %v982_v53, %v981_v48  ;;  %v1034_v57 = vpop.f32.mrf.mxu1 }
 0x109   : > { %v984_v58 = vpop.f32.mrf.mxu0  ;;  %v1035_v62 = vadd.f32 %v1034_v57, %v1033_v52 }
 0x10a   : > { %792 = vst.msk [vmem:[%s1304_s10 + $0x10] sm:$0xf] %vm787_vm0, %v940_v54  ;;  %v736_v59 = vmax.f32 %v705_v55, 0.0  ;;  %v630_v61 = vadd.f32 %v983_v56, %v1296_v60  ;;  %v1036_v63 = vpop.f32.mrf.mxu1 }
 0x10b   : > { %v985_v0 = vpop.f32.mrf.mxu0 }
 0x10c   : > { %v941_v1 = vpack.c.bf16 %v736_v59, %v736_v59  ;;  %v710_v2 = vadd.f32 %v1035_v62, %v630_v61  ;;  %v986_v3 = vadd.f32 %v985_v0, %v984_v58  ;;  %v1037_v4 = vpop.f32.mrf.mxu1 }
 0x10d   : > { %v987_v5 = vpop.f32.mrf.mxu0  ;;  %v1038_v8 = vadd.f32 %v1037_v4, %v1036_v63 }
 0x10e   : > { %793 = vst.msk [vmem:[%s1304_s10 + $0x14] sm:$0xf] %vm787_vm0, %v941_v1  ;;  %v737_v6 = vmax.f32 %v710_v2, 0.0  ;;  %v633_v7 = vadd.f32 %v986_v3, %v1296_v60  ;;  %v1039_v9 = vpop.f32.mrf.mxu1 }
 0x10f   : > { %v988_v10 = vpop.f32.mrf.mxu0 }
 0x110   : > { %v942_v11 = vpack.c.bf16 %v737_v6, %v737_v6  ;;  %v713_v12 = vadd.f32 %v1038_v8, %v633_v7  ;;  %v989_v13 = vadd.f32 %v988_v10, %v987_v5  ;;  %v1040_v14 = vpop.f32.mrf.mxu1 }
 0x111   : > { %v990_v15 = vpop.f32.mrf.mxu0  ;;  %v1041_v18 = vadd.f32 %v1040_v14, %v1039_v9 }
 0x112   : > { %794 = vst.msk [vmem:[%s1304_s10 + $0x18] sm:$0xf] %vm787_vm0, %v942_v11  ;;  %v738_v16 = vmax.f32 %v713_v12, 0.0  ;;  %v638_v17 = vadd.f32 %v989_v13, %v1296_v60  ;;  %v1042_v19 = vpop.f32.mrf.mxu1 }
 0x113   : > { %v991_v20 = vpop.f32.mrf.mxu0 }
 0x114   : > { %v943_v21 = vpack.c.bf16 %v738_v16, %v738_v16  ;;  %v718_v22 = vadd.f32 %v1041_v18, %v638_v17  ;;  %v992_v23 = vadd.f32 %v991_v20, %v990_v15  ;;  %v1043_v24 = vpop.f32.mrf.mxu1 }
 0x115   : > { %v993_v25 = vpop.f32.mrf.mxu0  ;;  %v1044_v28 = vadd.f32 %v1043_v24, %v1042_v19 }
 0x116   : > { %795 = vst.msk [vmem:[%s1304_s10 + $0x1c] sm:$0xf] %vm787_vm0, %v943_v21  ;;  %v739_v26 = vmax.f32 %v718_v22, 0.0  ;;  %v641_v27 = vadd.f32 %v992_v23, %v1296_v60  ;;  %v1045_v29 = vpop.f32.mrf.mxu1 }
 0x117   : > { %v994_v30 = vpop.f32.mrf.mxu0 }
 0x118   : > { %v944_v31 = vpack.c.bf16 %v739_v26, %v739_v26  ;;  %v721_v32 = vadd.f32 %v1044_v28, %v641_v27  ;;  %v995_v33 = vadd.f32 %v994_v30, %v993_v25  ;;  %v1046_v34 = vpop.f32.mrf.mxu1 }
 0x119   : > { %v996_v35 = vpop.f32.mrf.mxu0  ;;  %v1047_v38 = vadd.f32 %v1046_v34, %v1045_v29 }
 0x11a   : > { %796 = vst.msk [vmem:[%s1304_s10 + $0x20] sm:$0xf] %vm787_vm0, %v944_v31  ;;  %v740_v36 = vmax.f32 %v721_v32, 0.0  ;;  %v646_v37 = vadd.f32 %v995_v33, %v1296_v60  ;;  %v1048_v39 = vpop.f32.mrf.mxu1 }
 0x11b   : > { %v997_v40 = vpop.f32.mrf.mxu0 }
 0x11c   : > { %v945_v41 = vpack.c.bf16 %v740_v36, %v740_v36  ;;  %v726_v42 = vadd.f32 %v1047_v38, %v646_v37  ;;  %v1049_v43 = vpop.f32.mrf.mxu1 }
 0x11e   : > { %797 = vst.msk [vmem:[%s1304_s10 + $0x24] sm:$0xf] %vm787_vm0, %v945_v41  ;;  %v741_v44 = vmax.f32 %v726_v42, 0.0 }
 0x120   : > { %v946_v46 = vpack.c.bf16 %v741_v44, %v741_v44 }
 0x122   : > { %v802_v47 = vsel %vm800_vm3, %v946_v46, %v801_v45 }
 0x123   : > { %803 = vst [vmem:[%s1304_s10 + $0x28] sm:$0x1] %v802_v47 }
 0x124 PF: > { %s13_s12 = sadd.s32 1, %s1133_s12  }
 0x125   : > { %p10_p4 = scmp.ge.s32.totalorder %s13_s12, 4  }
 0x127   :  { %12 = sbr.rel (!%p10_p4) target bundleno = 1 (0x1), region = 62 }

// kernel: dqn_forward.6
= control target key start
LH: loop header
LB: loop body
LE: loop exit
PB: predicated region body
PF: predicated region fallthrough
CT: control target
= control target key end

     0   :  { %s1237_s12 = smov 0   ;;  %s1431_s0 = inlined_call_operand.vmem [shape: bf16[2,49,640], index: 0, kind: input, shape index: {}]   ;;  %s1432_s1 = inlined_call_operand.vmem [shape: bf16[640,64], index: 1, kind: input, shape index: {}]   ;;  %s1433_s2 = inlined_call_operand.vmem [shape: f32[1,64], index: 2, kind: input, shape index: {}]   ;;  %s1434_s3 = inlined_call_operand.vmem [shape: bf16[2,50,64], index: 3, kind: output, shape index: {}]  }
   0x1 LB: > { %s917_s13 = sadd.s32 4294967295, %s1215_s12   ;;  %p921_p0 = scmp.ge.s32.totalorder %s1215_s12, 1  ;;  %s1215_s12 = sphi %s1237_s12, %s13_s12  }
   0x2   : > { %p137_p1 = scmp.lt.s32.totalorder %s1215_s12, 3 }
   0x4   : > { %p138_p2 = pnand %p921_p0, %p137_p1 }
   0x5   : > { %p161_p3 = scmp.lt.s32.totalorder (!%p138_p2), %s917_s13, 1 }
   0x6   : > { %141 = sbr.rel (%p138_p2) target bundleno = 289 (0x121), region = 32 }
   0xb   : > { %v1143_v0 = vld [vmem:[%s1432_s1 + $0x78] sm:$0xff]   ;;  %v1147_v4 = vld [vmem:[%s1432_s1 + $0x70] sm:$0xff]   ;;  %v1151_v8 = vld [vmem:[%s1432_s1 + $0x68] sm:$0xff]   ;;  %s1438_s13 = smov (!%p161_p3, %s917_s13), 1  ;;  %vm851_vm0 = vcmask 516096   ;;  %vm844_vm2 = vcmask 519168  }
   0xc   : > { %v1144_v1 = vld [vmem:[%s1432_s1 + $0xf8] sm:$0xff]   ;;  %1001 = vmatprep.subr.bf16.mxu0 %v1143_v0  ;;  %v1148_v5 = vld [vmem:[%s1432_s1 + $0xf0] sm:$0xff]   ;;  %v1152_v9 = vld [vmem:[%s1432_s1 + $0xe8] sm:$0xff]   ;;  %s1133_s16 = smul.u32 140, %s1438_s13  ;;  %vm852_vm1 = vsmask.f32 256 }
   0xd   : > { %v1145_v2 = vld [vmem:[%s1432_s1 + $0x38] sm:$0xff]   ;;  %1041 = vmatprep.subr.bf16.mxu1 %v1144_v1  ;;  %v1149_v6 = vld [vmem:[%s1432_s1 + $0x30] sm:$0xff]   ;;  %v1153_v10 = vld [vmem:[%s1432_s1 + $0x28] sm:$0xff]   ;;  %s1134_s25 = smul.u32 28, %s1438_s13  ;;  %vm857_vm4 = vsmask.f32 7938 }
   0xe   : > { %v1146_v3 = vld [vmem:[%s1432_s1 + $0xb8] sm:$0xff]   ;;  %1002 = vmatpush3.bf16.msra.mxu0 %v1145_v2  ;;  %v1150_v7 = vld [vmem:[%s1432_s1 + $0xb0] sm:$0xff]   ;;  %v1154_v11 = vld [vmem:[%s1432_s1 + $0xa8] sm:$0xff]   ;;  %s1345_s27 = scalar_lea.vmem %s1431_s0, %s1133_s16 }
   0xf   : > { %1042 = vmatpush3.bf16.msra.mxu1 %v1146_v3  ;;  %1003 = vmatprep.subr.bf16.mxu0 %v1147_v4  ;;  %v1155_v12 = vld [vmem:[%s1432_s1 + $0x60] sm:$0xff]   ;;  %v1159_v16 = vld [vmem:[%s1432_s1 + $0x58] sm:$0xff]   ;;  %v1163_v20 = vld [vmem:[%s1432_s1 + $0x50] sm:$0xff]   ;;  %s1402_s28 = scalar_lea.vmem %s1434_s3, %s1134_s25 }
  0x10   : > { %1043 = vmatprep.subr.bf16.mxu1 %v1148_v5  ;;  %v1156_v13 = vld [vmem:[%s1432_s1 + $0xe0] sm:$0xff]   ;;  %v1160_v17 = vld [vmem:[%s1432_s1 + $0xd8] sm:$0xff]   ;;  %v1164_v21 = vld [vmem:[%s1432_s1 + $0xd0] sm:$0xff]  }
  0x11   : > { %v1157_v14 = vld [vmem:[%s1432_s1 + $0x20] sm:$0xff]   ;;  %v1161_v18 = vld [vmem:[%s1432_s1 + $0x18] sm:$0xff]   ;;  %v1165_v22 = vld [vmem:[%s1432_s1 + $0x10] sm:$0xff]  }
  0x12   : > { %1004 = vmatpush3.bf16.msra.mxu0 %v1149_v6  ;;  %v1158_v15 = vld [vmem:[%s1432_s1 + $0xa0] sm:$0xff]   ;;  %v1162_v19 = vld [vmem:[%s1432_s1 + $0x98] sm:$0xff]   ;;  %v1166_v23 = vld [vmem:[%s1432_s1 + $0x90] sm:$0xff]  }
  0x13   : > { %1044 = vmatpush3.bf16.msra.mxu1 %v1150_v7  ;;  %1005 = vmatprep.subr.bf16.mxu0 %v1151_v8  ;;  %v1167_v24 = vld [vmem:[%s1432_s1 + $0x48] sm:$0xff]   ;;  %v1171_v28 = vld [vmem:[%s1432_s1 + $0x40] sm:$0xff]   ;;  %v1181_v36 = vld [vmem:[%s1432_s1 + $0x138] sm:$0xff]  }
  0x14   : > { %1045 = vmatprep.subr.bf16.mxu1 %v1152_v9  ;;  %v1168_v25 = vld [vmem:[%s1432_s1 + $0xc8] sm:$0xff]   ;;  %v1172_v29 = vld [vmem:[%s1432_s1 + $0xc0] sm:$0xff]   ;;  %v1182_v37 = vld [vmem:[%s1432_s1 + $0x130] sm:$0xff]  }
  0x15   : > { %v1169_v26 = vld [vmem:[%s1432_s1 + $0x8] sm:$0xff]   ;;  %v1173_v30 = vld [vmem:[%s1432_s1] sm:$0xff]   ;;  %v1193_v45 = vld [vmem:[%s1345_s27 + $0x5c] ss:$20 sps:$4 sm:$0xff]  }
  0x16   : > { %1006 = vmatpush3.bf16.msra.mxu0 %v1153_v10  ;;  %v1170_v27 = vld [vmem:[%s1432_s1 + $0x88] sm:$0xff]   ;;  %v1174_v31 = vld [vmem:[%s1432_s1 + $0x80] sm:$0xff]   ;;  %v1197_v46 = vld [vmem:[%s1432_s1 + $0x118] sm:$0xff]  }
  0x17   : > { %1046 = vmatpush3.bf16.msra.mxu1 %v1154_v11  ;;  %1007 = vmatprep.subr.bf16.mxu0 %v1155_v12  ;;  %v1175_v32 = vld [vmem:[%s1345_s27] ss:$20 sps:$4 sm:$0xff]   ;;  %v1177_v33 = vld [vmem:[%s1345_s27 + $0x4] ss:$20 sps:$4 sm:$0xff]   ;;  %v1178_v34 = vld [vmem:[%s1345_s27 + $0x8] ss:$20 sps:$4 sm:$0xff]  }
  0x18   : > { %1047 = vmatprep.subr.bf16.mxu1 %v1156_v13  ;;  %v1180_v35 = vld [vmem:[%s1345_s27 + $0xc] ss:$20 sps:$4 sm:$0xff]   ;;  %648 = vmatprep.mubr.bf16.mxu0 %v1177_v33  ;;  %v1185_v39 = vld [vmem:[%s1345_s27 + $0x34] ss:$20 sps:$4 sm:$0xff]   ;;  %v1188_v42 = vld [vmem:[%s1345_s27 + $0x30] ss:$20 sps:$4 sm:$0xff]  }
  0x19   : > { %712 = vmatprep.mubr.bf16.mxu1 %v1180_v35  ;;  %v1183_v38 = vld [vmem:[%s1345_s27 + $0x2c] ss:$20 sps:$4 sm:$0xff]   ;;  %v1187_v40 = vld [vmem:[%s1345_s27 + $0x28] ss:$20 sps:$4 sm:$0xff]   ;;  %v1195_v49 = vld [vmem:[%s1345_s27 + $0x50] ss:$20 sps:$4 sm:$0xff]  }
  0x1a   : > { %1008 = vmatpush3.bf16.msra.mxu0 %v1157_v14  ;;  %v1189_v41 = vld [vmem:[%s1432_s1 + $0x128] sm:$0xff]   ;;  %v1190_v44 = vld [vmem:[%s1432_s1 + $0x120] sm:$0xff]   ;;  %v190_v47 = vld [vmem:[%s1345_s27 + $0x78] sm:$0x11] }
  0x1b   : > { %1048 = vmatpush3.bf16.msra.mxu1 %v1158_v15  ;;  %1009 = vmatprep.subr.bf16.mxu0 %v1159_v16  ;;  %v1191_v43 = vld [vmem:[%s1345_s27 + $0x54] ss:$20 sps:$4 sm:$0xff]   ;;  %v191_v48 = vld [vmem:[%s1345_s27 + $0x80] sm:$0x11]  ;;  %v1196_v50 = vld [vmem:[%s1345_s27 + $0x58] ss:$20 sps:$4 sm:$0xff]   ;;  %v941_v51 = vcombine.high %v190_v47, %v190_v47  ;;  %v940_v55 = vcombine.low %v190_v47, %v190_v47 }
  0x1c   : > { %1049 = vmatprep.subr.bf16.mxu1 %v1160_v17  ;;  %v943_v52 = vcombine.high %v191_v48, %v191_v48  ;;  %v1198_v53 = vld [vmem:[%s1432_s1 + $0x110] sm:$0xff]   ;;  %v1203_v54 = vld [vmem:[%s1432_s1 + $0x108] sm:$0xff]   ;;  %v942_v56 = vcombine.low %v191_v48, %v191_v48  ;;  %v1204_v59 = vld [vmem:[%s1432_s1 + $0x100] sm:$0xff]  }
  0x1d   : > { %v1205_v57 = vld [vmem:[%s1345_s27 + $0x10] ss:$20 sps:$4 sm:$0xff]   ;;  %v1206_v58 = vld [vmem:[%s1345_s27 + $0x60] ss:$20 sps:$4 sm:$0xff]   ;;  %v1207_v60 = vld [vmem:[%s1345_s27 + $0x38] ss:$20 sps:$4 sm:$0xff]  }
  0x1e   : > { %1010 = vmatpush3.bf16.msra.mxu0 %v1161_v18  ;;  %v1208_v61 = vld [vmem:[%s1345_s27 + $0x88] ss:$0 sps:$4 sm:$0x11]   ;;  %vm1405_vm3 = vmand %vm851_vm0, %vm852_vm1 }
  0x1f   : > { %1050 = vmatpush3.bf16.msra.mxu1 %v1162_v19  ;;  %1011 = vmatprep.subr.bf16.mxu0 %v1163_v20  ;;  %vm858_vm5 = vmand %vm851_vm0, %vm857_vm4 }
  0x20   : > { %1051 = vmatprep.subr.bf16.mxu1 %v1164_v21 }
  0x22   : > { %1012 = vmatpush3.bf16.msra.mxu0 %v1165_v22 }
  0x23   : > { %1052 = vmatpush3.bf16.msra.mxu1 %v1166_v23  ;;  %1013 = vmatprep.subr.bf16.mxu0 %v1167_v24 }
  0x24   : > { %1053 = vmatprep.subr.bf16.mxu1 %v1168_v25 }
  0x26   : > { %1014 = vmatpush3.bf16.msra.mxu0 %v1169_v26 }
  0x27   : > { %1054 = vmatpush3.bf16.msra.mxu1 %v1170_v27  ;;  %1015 = vmatprep.subr.bf16.mxu0 %v1171_v28  ;;  %v924_v27 = vld [vmem:[%s1433_s2] ss:$0 sm:$0xff] }
  0x28   : > { %1055 = vmatprep.subr.bf16.mxu1 %v1172_v29 }
  0x2a   : > { %1016 = vmatpush3.bf16.msra.mxu0 %v1173_v30 }
  0x2b   : > { %1056 = vmatpush3.bf16.msra.mxu1 %v1174_v31  ;;  %1093 = vmatprep.subr.bf16.mxu0 %v1181_v36 }
  0x2c   : > { %1117 = vmatprep.subr.bf16.mxu1 %v1181_v36 }
  0x2d   : > { %649 = vmatmul.mubr.bf16.vlgmr.msra.gmra.mxu0 %v1175_v32 }
  0x2e   : > { %713 = vmatmul.mubr.bf16.vlgmr.msra.gmra.mxu1 %v1178_v34  ;;  %1094 = vmatpush3.bf16.msra.mxu0 %v1181_v36 }
  0x2f   : > { %1125 = vmatpush3.bf16.msra.mxu1 %v1181_v36  ;;  %1095 = vmatprep.subr.bf16.mxu0 %v1182_v37 }
  0x30   : > { %1118 = vmatprep.subr.bf16.mxu1 %v1182_v37  ;;  %656 = vmatprep.mubr.bf16.mxu0 %v1183_v38 }
  0x31   : > { %720 = vmatprep.mubr.bf16.mxu1 %v1185_v39 }
  0x32   : > { %1096 = vmatpush3.bf16.msra.mxu0 %v1182_v37 }
  0x33   : > { %1126 = vmatpush3.bf16.msra.mxu1 %v1182_v37  ;;  %1097 = vmatprep.subr.bf16.mxu0 %v1189_v41 }
  0x34   : > { %1119 = vmatprep.subr.bf16.mxu1 %v1189_v41 }
  0x35   : > { %657 = vmatmul.mubr.bf16.gmra.mxu0 %v1187_v40 }
  0x36   : > { %721 = vmatmul.mubr.bf16.gmra.mxu1 %v1188_v42  ;;  %664 = vmatprep.mubr.bf16.mxu0 %v1191_v43 }
  0x37   : > { %1098 = vmatpush3.bf16.msra.mxu0 %v1189_v41  ;;  %728 = vmatprep.mubr.bf16.mxu1 %v1193_v45 }
  0x38   : > { %1127 = vmatpush3.bf16.msra.mxu1 %v1189_v41  ;;  %1099 = vmatprep.subr.bf16.mxu0 %v1190_v44 }
  0x39   : > { %1120 = vmatprep.subr.bf16.mxu1 %v1190_v44 }
  0x3b   : > { %1100 = vmatpush3.bf16.msra.mxu0 %v1190_v44 }
  0x3c   : > { %1128 = vmatpush3.bf16.msra.mxu1 %v1190_v44  ;;  %1101 = vmatprep.subr.bf16.mxu0 %v1197_v46 }
  0x3d   : > { %665 = vmatmul.mubr.bf16.gmra.mxu0 %v1195_v49  ;;  %1121 = vmatprep.subr.bf16.mxu1 %v1197_v46 }
  0x3e   : > { %729 = vmatmul.mubr.bf16.gmra.mxu1 %v1196_v50  ;;  %672 = vmatprep.mubr.bf16.mxu0 %v941_v51 }
  0x3f   : > { %1102 = vmatpush3.bf16.msra.mxu0 %v1197_v46  ;;  %736 = vmatprep.mubr.bf16.mxu1 %v943_v52 }
  0x40   : > { %1129 = vmatpush3.bf16.msra.mxu1 %v1197_v46  ;;  %1103 = vmatprep.subr.bf16.mxu0 %v1198_v53 }
  0x41   : > { %1122 = vmatprep.subr.bf16.mxu1 %v1198_v53 }
  0x43   : > { %1104 = vmatpush3.bf16.msra.mxu0 %v1198_v53 }
  0x44   : > { %1130 = vmatpush3.bf16.msra.mxu1 %v1198_v53  ;;  %1105 = vmatprep.subr.bf16.mxu0 %v1203_v54 }
  0x45   : > { %673 = vmatmul.mubr.bf16.gmra.mxu0 %v940_v55  ;;  %1123 = vmatprep.subr.bf16.mxu1 %v1203_v54 }
  0x46   : > { %737 = vmatmul.mubr.bf16.gmra.mxu1 %v942_v56  ;;  %1109 = vmatprep.mubr.bf16.mxu0 %v1205_v57 }
  0x47   : > { %1106 = vmatpush3.bf16.msra.mxu0 %v1203_v54  ;;  %1113 = vmatprep.mubr.bf16.mxu1 %v1206_v58 }
  0x48   : > { %1131 = vmatpush3.bf16.msra.mxu1 %v1203_v54  ;;  %1107 = vmatprep.subr.bf16.mxu0 %v1204_v59 }
  0x49   : > { %1124 = vmatprep.subr.bf16.mxu1 %v1204_v59 }
  0x4b   : > { %1108 = vmatpush3.bf16.msra.mxu0 %v1204_v59 }
  0x4c   : > { %1132 = vmatpush3.bf16.msra.mxu1 %v1204_v59 }
  0x4e   : > { %1110 = vmatmul.mubr.bf16.vlgmr.msra.gmra.mxu0 %v1207_v60 }
  0x4f   : > { %1114 = vmatmul.mubr.bf16.vlgmr.msra.gmra.mxu1 %v1208_v61 }
  0xed   : > { %v1017_v62 = vpop.f32.mrf.mxu0 }
  0xee   : > { %v1057_v63 = vpop.f32.mrf.mxu1 }
  0xef   : > { %v1018_v0 = vpop.f32.mrf.mxu0 }
  0xf0   : > { %v1058_v1 = vpop.f32.mrf.mxu1  ;;  %v1019_v25 = vadd.f32 %v1018_v0, %v1017_v62 }
  0xf1   : > { %v1020_v2 = vpop.f32.mrf.mxu0  ;;  %v1059_v45 = vadd.f32 %v1058_v1, %v1057_v63 }
  0xf2   : > { %v1060_v3 = vpop.f32.mrf.mxu1  ;;  %v651_v37 = vadd.f32 %v1019_v25, %v924_v27 }
  0xf3   : > { %v1021_v4 = vpop.f32.mrf.mxu0 }
  0xf4   : > { %v1061_v5 = vpop.f32.mrf.mxu1  ;;  %v1022_v38 = vadd.f32 %v1021_v4, %v1020_v2  ;;  %v715_v54 = vadd.f32 %v1059_v45, %v651_v37 }
  0xf5   : > { %v1023_v6 = vpop.f32.mrf.mxu0  ;;  %v1062_v59 = vadd.f32 %v1061_v5, %v1060_v3 }
  0xf6   : > { %v1063_v7 = vpop.f32.mrf.mxu1  ;;  %v654_v50 = vadd.f32 %v1022_v38, %v924_v27 }
  0xf7   : > { %v1024_v8 = vpop.f32.mrf.mxu0 }
  0xf8   : > { %v1064_v9 = vpop.f32.mrf.mxu1  ;;  %v1025_v22 = vadd.f32 %v1024_v8, %v1023_v6  ;;  %v854_v8 = vld [vmem:[%s1402_s28 + $0x18] sm:$0x1] }
  0xf9   : > { %v1026_v10 = vpop.f32.mrf.mxu0  ;;  %v1065_v39 = vadd.f32 %v1064_v9, %v1063_v7 }
  0xfa   : > { %v1066_v11 = vpop.f32.mrf.mxu1  ;;  %v659_v31 = vadd.f32 %v1025_v22, %v924_v27 }
  0xfb   : > { %v1027_v12 = vpop.f32.mrf.mxu0 }
  0xfc   : > { %v1067_v13 = vpop.f32.mrf.mxu1  ;;  %v1028_v32 = vadd.f32 %v1027_v12, %v1026_v10  ;;  %v723_v47 = vadd.f32 %v1065_v39, %v659_v31  ;;  %v718_v10 = vadd.f32 %v1062_v59, %v654_v50 }
  0xfd   : > { %v1029_v14 = vpop.f32.mrf.mxu0  ;;  %v1068_v51 = vadd.f32 %v1067_v13, %v1066_v11 }
  0xfe   : > { %v1069_v15 = vpop.f32.mrf.mxu1  ;;  %v662_v46 = vadd.f32 %v1028_v32, %v924_v27 }
  0xff   : > { %v1030_v16 = vpop.f32.mrf.mxu0 }
 0x100   : > { %v1070_v17 = vpop.f32.mrf.mxu1  ;;  %v1031_v28 = vadd.f32 %v1030_v16, %v1029_v14  ;;  %v726_v63 = vadd.f32 %v1068_v51, %v662_v46 }
 0x101   : > { %v1032_v18 = vpop.f32.mrf.mxu0  ;;  %v1071_v48 = vadd.f32 %v1070_v17, %v1069_v15 }
 0x102   : > { %v1072_v19 = vpop.f32.mrf.mxu1  ;;  %v667_v41 = vadd.f32 %v1031_v28, %v924_v27 }
 0x103   : > { %v1033_v20 = vpop.f32.mrf.mxu0 }
 0x104   : > { %v1073_v21 = vpop.f32.mrf.mxu1  ;;  %v1034_v42 = vadd.f32 %v1033_v20, %v1032_v18  ;;  %v731_v58 = vadd.f32 %v1071_v48, %v667_v41 }
 0x105   : > { %v1035_v23 = vpop.f32.mrf.mxu0  ;;  %v1074_v0 = vadd.f32 %v1073_v21, %v1072_v19 }
 0x106   : > { %v1075_v24 = vpop.f32.mrf.mxu1  ;;  %v670_v55 = vadd.f32 %v1034_v42, %v924_v27 }
 0x107   : > { %v1036_v26 = vpop.f32.mrf.mxu0 }
 0x108   : > { %v1037_v29 = vadd.f32 %v1036_v26, %v1035_v23  ;;  %v1076_v30 = vpop.f32.mrf.mxu1  ;;  %v734_v14 = vadd.f32 %v1074_v0, %v670_v55 }
 0x109   : > { %v1038_v33 = vpop.f32.mrf.mxu0  ;;  %v1077_v35 = vadd.f32 %v1076_v30, %v1075_v24 }
 0x10a   : > { %v675_v34 = vadd.f32 %v1037_v29, %v924_v27  ;;  %v1078_v36 = vpop.f32.mrf.mxu1 }
 0x10b   : > { %v1039_v40 = vpop.f32.mrf.mxu0 }
 0x10c   : > { %v1079_v43 = vpop.f32.mrf.mxu1  ;;  %v739_v44 = vadd.f32 %v1077_v35, %v675_v34 }
 0x10e   : > { %v1111_v49 = vpop.f32.mrf.mxu0 }
 0x10f   : > { %v787_v52 = vadd.f32 %v1111_v49, %v723_v47  ;;  %v1115_v53 = vpop.f32.mrf.mxu1 }
 0x110   : > { %v803_v56 = vadd.f32 %v1115_v53, %v739_v44  ;;  %v778_v57 = vpop.f32.mrf.mxu0 }
 0x111   : > { %v810_v60 = vmax.f32 %v787_v52, 0.0  ;;  %v779_v61 = vadd.f32 %v778_v57, %v715_v54  ;;  %v794_v62 = vpop.f32.mrf.mxu1 }
 0x112   : > { %v814_v1 = vmax.f32 %v803_v56, 0.0  ;;  %v795_v2 = vadd.f32 %v794_v62, %v731_v58  ;;  %v1112_v4 = vpop.f32.mrf.mxu0 }
 0x113   : > { %v996_v6 = vpack.c.bf16 %v810_v60, %v810_v60  ;;  %v808_v9 = vmax.f32 %v779_v61, 0.0  ;;  %v790_v3 = vadd.f32 %v1112_v4, %v726_v63  ;;  %v1116_v5 = vpop.f32.mrf.mxu1 }
 0x114   : > { %v1000_v11 = vpack.c.bf16 %v814_v1, %v814_v1  ;;  %v812_v12 = vmax.f32 %v795_v2, 0.0  ;;  %v781_v13 = vpop.f32.mrf.mxu0 }
 0x115   : > { %847 = vst.msk [vmem:[%s1402_s28 + $0x8] sm:$0xf] %vm844_vm2, %v996_v6  ;;  %v994_v15 = vpack.c.bf16 %v808_v9, %v808_v9  ;;  %v811_v16 = vmax.f32 %v790_v3, 0.0  ;;  %v782_v17 = vadd.f32 %v781_v13, %v718_v10  ;;  %v797_v18 = vpop.f32.mrf.mxu1 }
 0x116   : > { %v855_v19 = vsel %vm1405_vm3, %v1000_v11, %v854_v8  ;;  %v998_v20 = vpack.c.bf16 %v812_v12, %v812_v12  ;;  %v798_v21 = vadd.f32 %v797_v18, %v734_v14 }
 0x117   : > { %856 = vst [vmem:[%s1402_s28 + $0x18] sm:$0x1] %v855_v19  ;;  %845 = vst.msk [vmem:[%s1402_s28] sm:$0xf] %vm844_vm2, %v994_v15  ;;  %v997_v22 = vpack.c.bf16 %v811_v16, %v811_v16  ;;  %v809_v23 = vmax.f32 %v782_v17, 0.0 }
 0x118   : > { %849 = vst.msk [vmem:[%s1402_s28 + $0x10] sm:$0xf] %vm844_vm2, %v998_v20  ;;  %v813_v24 = vmax.f32 %v798_v21, 0.0 }
 0x119   : > { %848 = vst.msk [vmem:[%s1402_s28 + $0xc] sm:$0xf] %vm844_vm2, %v997_v22  ;;  %v995_v25 = vpack.c.bf16 %v809_v23, %v809_v23 }
 0x11a   : > { %v999_v26 = vpack.c.bf16 %v813_v24, %v813_v24 }
 0x11b   : > { %846 = vst.msk [vmem:[%s1402_s28 + $0x4] sm:$0xf] %vm844_vm2, %v995_v25 }
 0x11c   : > { %850 = vst.msk [vmem:[%s1402_s28 + $0x14] sm:$0xf] %vm844_vm2, %v999_v26 }
 0x11e   : > { %v859_v27 = vld [vmem:[%s1402_s28 + $0x18] sm:$0x1] }
 0x11f   : > { %v860_v28 = vsel %vm858_vm5, 0, %v859_v27 }
 0x120   : > { %861 = vst [vmem:[%s1402_s28 + $0x18] sm:$0x1] %v860_v28 }
 0x121 PF: > { %s13_s12 = sadd.s32 1, %s1215_s12  }
 0x122   : > { %p10_p4 = scmp.ge.s32.totalorder %s13_s12, 4  }
 0x124   :  { %12 = sbr.rel (!%p10_p4) target bundleno = 1 (0x1), region = 62 }

// kernel: dqn_forward.7
= control target key start
LH: loop header
LB: loop body
LE: loop exit
PB: predicated region body
PF: predicated region fallthrough
CT: control target
= control target key end

     0   :  { %10 = vsyncpa [#allocation4], 0  ;;  %s2684_s18 = smov 0   ;;  %s2686_s19 = smov 0   ;;  %s3061_s0 = inlined_call_operand.vmem [shape: bf16[2,3200], index: 0, kind: input, shape index: {}]   ;;  %s3062_s1 = inlined_call_operand.vmem [shape: bf16[3200,512], index: 1, kind: input, shape index: {}]   ;;  %s3063_s2 = inlined_call_operand.vmem [shape: f32[1,512], index: 2, kind: input, shape index: {}]   ;;  %s3064_s3 = inlined_call_operand.vmem [shape: bf16[512,6], index: 3, kind: input, shape index: {}]   ;;  %s3065_s4 = inlined_call_operand.vmem [shape: f32[1,6], index: 4, kind: input, shape index: {}]   ;;  %s3066_s5 = inlined_call_operand.hbm [shape: f32[2,6], index: 5, kind: output, shape index: {}]  }
   0x1   :  { %s2688_s20 = smov 0  }
   0x2 LB: > { %s2039_s21 = sadd.s32 4294967295, %s2647_s20   ;;  %s25_s22 = sadd.s32 1, %s2643_s19  ;;  %s2647_s20 = sphi %s2688_s20, %s16_s20   ;;  %s2643_s19 = sphi %s2686_s19, %s3069_s19   ;;  %s2639_s18 = sphi %s2684_s18, %s3068_s18  }
   0x3   : > { %p26_p0 = scmp.ge.s32.totalorder %s25_s22, 5  ;;  %p2042_p1 = scmp.ge.s32.totalorder %s2647_s20, 1 }
   0x4   : > { %p218_p2 = scmp.lt.s32.totalorder %s2647_s20, 6 }
   0x5   : > { %s3071_s22 = smov (%p26_p0, %s25_s22), 0 }
   0x6   : > { %p219_p3 = pnand %p2042_p1, %p218_p2 }
   0x7   : > { %s250_s23 = smul.u32 (!%p219_p3), 5, %s2639_s18  ;;  %p2045_p6 = scmp.ne.s32.totalorder (!%p219_p3), %s2639_s18, 0 }
   0x8   : > { %222 = sbr.rel (%p219_p3) target bundleno = 642 (0x282), region = 40 }
   0x9   : > { %s259_s24 = smul.u32 (!%p219_p3), 80, %s2639_s18  ;;  %p253_p4 = scmp.lt.s32.totalorder (!%p219_p3), %s250_s23, 24 }
   0xb   : > { %p260_p5 = scmp.lt.s32.totalorder (!%p219_p3), %s259_s24, 399 }
   0xd   : > { %s3073_s23 = smov (!%p253_p4, %s250_s23), 24  ;;  %s3075_s24 = smov (!%p260_p5, %s259_s24), 399 }
   0xe   : > { %s257_s27 = scalar_lea.vmem %s3061_s0, %s3073_s23  ;;  %s2244_s28 = sshll.u32 %s3075_s24, 4 }
   0xf   : > { %s2716_s6 = scalar_lea.vmem %s3062_s1, %s2244_s28  ;;  %270 = sbr.rel (%p2045_p6) target bundleno = 22 (0x16), region = 44 }
  0x14   : > { %v2649_v0 = vmov 0.0  }
  0x15   : > { %271 = vst [vmem:[#allocation2] sm:$0xff] %v2649_v0 }
  0x16 PF: > { %v2324_v1 = vld [vmem:[%s2716_s6 + $0xe4] ss:$16 sps:$4 sm:$0xff]   ;;  %v2328_v3 = vld [vmem:[%s2716_s6 + $0xe0] ss:$16 sps:$4 sm:$0xff]   ;;  %v2650_v37 = vmov 1966171168   ;;  %v439_v39 = vlaneseq }
  0x17   : > { %v2326_v2 = vld [vmem:[%s2716_s6 + $0x2e4] ss:$16 sps:$4 sm:$0xff]   ;;  %1279 = vmatprep.subr.bf16.mxu0 %v2324_v1  ;;  %v2329_v4 = vld [vmem:[%s2716_s6 + $0x2e0] ss:$16 sps:$4 sm:$0xff]   ;;  %v437_v38 = vunpack.c.l.s4 %v2650_v37  ;;  %p2206_p7 = scmp.ne.s32.totalorder %s2639_s18, 4 }
  0x18   : > { %1320 = vmatprep.subr.bf16.mxu1 %v2326_v2  ;;  %v2330_v5 = vld [vmem:[%s2716_s6 + $0xc4] ss:$16 sps:$4 sm:$0xff]   ;;  %1280 = vmatpush1.bf16.msra.mxu0 %v2328_v3  ;;  %v2334_v7 = vld [vmem:[%s2716_s6 + $0xc0] ss:$16 sps:$4 sm:$0xff]   ;;  %v2758_v44 = vshrl.u32 %v439_v39, 7 }
  0x19   : > { %1321 = vmatpush1.bf16.msra.mxu1 %v2329_v4  ;;  %v2332_v6 = vld [vmem:[%s2716_s6 + $0x2c4] ss:$16 sps:$4 sm:$0xff]   ;;  %1281 = vmatprep.subr.bf16.mxu0 %v2330_v5  ;;  %v2335_v8 = vld [vmem:[%s2716_s6 + $0x2c0] ss:$16 sps:$4 sm:$0xff]   ;;  %v438_v43 = vunpack.c.0.s8 %v437_v38  ;;  %v2454_v38 = vld [vmem:[%s2716_s6 + $0x48] ss:$16 sps:$4 sm:$0xff]  }
  0x1a   : > { %1322 = vmatprep.subr.bf16.mxu1 %v2332_v6  ;;  %v2336_v9 = vld [vmem:[%s2716_s6 + $0xa4] ss:$16 sps:$4 sm:$0xff]   ;;  %v2340_v11 = vld [vmem:[%s2716_s6 + $0xa0] ss:$16 sps:$4 sm:$0xff]  }
  0x1b   : > { %v2338_v10 = vld [vmem:[%s2716_s6 + $0x2a4] ss:$16 sps:$4 sm:$0xff]   ;;  %v2341_v12 = vld [vmem:[%s2716_s6 + $0x2a0] ss:$16 sps:$4 sm:$0xff]   ;;  %v2766_v50 = vsub.s32 %v438_v43, %v2758_v44  ;;  %v2460_v43 = vld [vmem:[%s2716_s6 + $0x28] ss:$16 sps:$4 sm:$0xff]  }
  0x1c   : > { %1282 = vmatpush1.bf16.msra.mxu0 %v2334_v7  ;;  %v2342_v13 = vld [vmem:[%s2716_s6 + $0x84] ss:$16 sps:$4 sm:$0xff]   ;;  %v2346_v15 = vld [vmem:[%s2716_s6 + $0x80] ss:$16 sps:$4 sm:$0xff]  }
  0x1d   : > { %1323 = vmatpush1.bf16.msra.mxu1 %v2335_v8  ;;  %1283 = vmatprep.subr.bf16.mxu0 %v2336_v9  ;;  %v2344_v14 = vld [vmem:[%s2716_s6 + $0x284] ss:$16 sps:$4 sm:$0xff]   ;;  %v2347_v16 = vld [vmem:[%s2716_s6 + $0x280] ss:$16 sps:$4 sm:$0xff]  }
  0x1e   : > { %1324 = vmatprep.subr.bf16.mxu1 %v2338_v10  ;;  %v2348_v17 = vld [vmem:[%s2716_s6 + $0x64] ss:$16 sps:$4 sm:$0xff]   ;;  %v2352_v19 = vld [vmem:[%s2716_s6 + $0x60] ss:$16 sps:$4 sm:$0xff]  }
  0x1f   : > { %v2350_v18 = vld [vmem:[%s2716_s6 + $0x264] ss:$16 sps:$4 sm:$0xff]   ;;  %v2353_v20 = vld [vmem:[%s2716_s6 + $0x260] ss:$16 sps:$4 sm:$0xff]  }
  0x20   : > { %1284 = vmatpush1.bf16.msra.mxu0 %v2340_v11  ;;  %v2354_v21 = vld [vmem:[%s2716_s6 + $0x44] ss:$16 sps:$4 sm:$0xff]   ;;  %v2358_v23 = vld [vmem:[%s2716_s6 + $0x40] ss:$16 sps:$4 sm:$0xff]  }
  0x21   : > { %1325 = vmatpush1.bf16.msra.mxu1 %v2341_v12  ;;  %1285 = vmatprep.subr.bf16.mxu0 %v2342_v13  ;;  %v2356_v22 = vld [vmem:[%s2716_s6 + $0x244] ss:$16 sps:$4 sm:$0xff]   ;;  %v2359_v24 = vld [vmem:[%s2716_s6 + $0x240] ss:$16 sps:$4 sm:$0xff]  }
  0x22   : > { %1326 = vmatprep.subr.bf16.mxu1 %v2344_v14  ;;  %v2360_v25 = vld [vmem:[%s2716_s6 + $0x24] ss:$16 sps:$4 sm:$0xff]   ;;  %v2364_v27 = vld [vmem:[%s2716_s6 + $0x20] ss:$16 sps:$4 sm:$0xff]   ;;  %v2426_v14 = vld [vmem:[%s2716_s6 + $0xec] ss:$16 sps:$4 sm:$0xff]  }
  0x23   : > { %v2362_v26 = vld [vmem:[%s2716_s6 + $0x224] ss:$16 sps:$4 sm:$0xff]   ;;  %v2365_v28 = vld [vmem:[%s2716_s6 + $0x220] ss:$16 sps:$4 sm:$0xff]  }
  0x24   : > { %1286 = vmatpush1.bf16.msra.mxu0 %v2346_v15  ;;  %v2366_v29 = vld [vmem:[%s2716_s6 + $0x4] ss:$16 sps:$4 sm:$0xff]   ;;  %v2370_v31 = vld [vmem:[%s2716_s6] ss:$16 sps:$4 sm:$0xff]  }
  0x25   : > { %1327 = vmatpush1.bf16.msra.mxu1 %v2347_v16  ;;  %1287 = vmatprep.subr.bf16.mxu0 %v2348_v17  ;;  %v2368_v30 = vld [vmem:[%s2716_s6 + $0x204] ss:$16 sps:$4 sm:$0xff]   ;;  %v2371_v32 = vld [vmem:[%s2716_s6 + $0x200] ss:$16 sps:$4 sm:$0xff]   ;;  %v2424_v17 = vld [vmem:[%s2716_s6 + $0xe8] ss:$16 sps:$4 sm:$0xff]  }
  0x26   : > { %1328 = vmatprep.subr.bf16.mxu1 %v2350_v18  ;;  %v2372_v33 = vld [vmem:[%s2716_s6 + $0x1e4] ss:$16 sps:$4 sm:$0xff]   ;;  %v2376_v35 = vld [vmem:[%s2716_s6 + $0x1e0] ss:$16 sps:$4 sm:$0xff]  }
  0x27   : > { %v2374_v34 = vld [vmem:[%s2716_s6 + $0x3e4] ss:$16 sps:$4 sm:$0xff]   ;;  %v2377_v36 = vld [vmem:[%s2716_s6 + $0x3e0] ss:$16 sps:$4 sm:$0xff]  }
  0x28   : > { %1288 = vmatpush1.bf16.msra.mxu0 %v2352_v19  ;;  %v2378_v40 = vld [vmem:[%s2716_s6 + $0x1c4] ss:$16 sps:$4 sm:$0xff]   ;;  %v2382_v42 = vld [vmem:[%s2716_s6 + $0x1c0] ss:$16 sps:$4 sm:$0xff]   ;;  %v2432_v19 = vld [vmem:[%s2716_s6 + $0xcc] ss:$16 sps:$4 sm:$0xff]  }
  0x29   : > { %1329 = vmatpush1.bf16.msra.mxu1 %v2353_v20  ;;  %1289 = vmatprep.subr.bf16.mxu0 %v2354_v21  ;;  %v2380_v41 = vld [vmem:[%s2716_s6 + $0x3c4] ss:$16 sps:$4 sm:$0xff]   ;;  %v2383_v45 = vld [vmem:[%s2716_s6 + $0x3c0] ss:$16 sps:$4 sm:$0xff]   ;;  %v2430_v21 = vld [vmem:[%s2716_s6 + $0xc8] ss:$16 sps:$4 sm:$0xff]  }
  0x2a   : > { %1330 = vmatprep.subr.bf16.mxu1 %v2356_v22  ;;  %v2384_v46 = vld [vmem:[%s2716_s6 + $0x1a4] ss:$16 sps:$4 sm:$0xff]   ;;  %v2388_v48 = vld [vmem:[%s2716_s6 + $0x1a0] ss:$16 sps:$4 sm:$0xff]  }
  0x2b   : > { %v2386_v47 = vld [vmem:[%s2716_s6 + $0x3a4] ss:$16 sps:$4 sm:$0xff]   ;;  %v2389_v49 = vld [vmem:[%s2716_s6 + $0x3a0] ss:$16 sps:$4 sm:$0xff]  }
  0x2c   : > { %1290 = vmatpush1.bf16.msra.mxu0 %v2358_v23  ;;  %v2390_v51 = vld [vmem:[%s2716_s6 + $0x184] ss:$16 sps:$4 sm:$0xff]   ;;  %v2394_v54 = vld [vmem:[%s2716_s6 + $0x180] ss:$16 sps:$4 sm:$0xff]   ;;  %v2438_v23 = vld [vmem:[%s2716_s6 + $0xac] ss:$16 sps:$4 sm:$0xff]  }
  0x2d   : > { %1331 = vmatpush1.bf16.msra.mxu1 %v2359_v24  ;;  %1291 = vmatprep.subr.bf16.mxu0 %v2360_v25  ;;  %v2392_v52 = vld [vmem:[%s2716_s6 + $0x384] ss:$16 sps:$4 sm:$0xff]   ;;  %v2395_v56 = vld [vmem:[%s2716_s6 + $0x380] ss:$16 sps:$4 sm:$0xff]   ;;  %v2651_v24 = vmov 0  }
  0x2e   : > { %1332 = vmatprep.subr.bf16.mxu1 %v2362_v26  ;;  %v2775_v53 = vld [vmem:[%s257_s27] sm:$0x1f]  ;;  %v2436_v26 = vld [vmem:[%s2716_s6 + $0xa8] ss:$16 sps:$4 sm:$0xff]  }
  0x2f   : > { %v442_v55 = vrot.slane %v2775_v53, %v2766_v50  ;;  %v2396_v57 = vld [vmem:[%s2716_s6 + $0x164] ss:$16 sps:$4 sm:$0xff]   ;;  %v2400_v60 = vld [vmem:[%s2716_s6 + $0x160] ss:$16 sps:$4 sm:$0xff]  }
  0x30   : > { %1292 = vmatpush1.bf16.msra.mxu0 %v2364_v27  ;;  %v2398_v58 = vld [vmem:[%s2716_s6 + $0x364] ss:$16 sps:$4 sm:$0xff]   ;;  %v2401_v62 = vld [vmem:[%s2716_s6 + $0x360] ss:$16 sps:$4 sm:$0xff]  }
  0x31   : > { %1333 = vmatpush1.bf16.msra.mxu1 %v2365_v28  ;;  %1293 = vmatprep.subr.bf16.mxu0 %v2366_v29  ;;  %v450_v59 = vcombine.high %v442_v55, %v442_v55  ;;  %v2402_v63 = vld [vmem:[%s2716_s6 + $0x144] ss:$16 sps:$4 sm:$0xff]   ;;  %v2406_v2 = vld [vmem:[%s2716_s6 + $0x140] ss:$16 sps:$4 sm:$0xff]   ;;  %v2801_v11 = vrot.slane %v442_v55, %v2766_v50  ;;  %v2444_v28 = vld [vmem:[%s2716_s6 + $0x8c] ss:$16 sps:$4 sm:$0xff]  }
  0x32   : > { %1334 = vmatprep.subr.bf16.mxu1 %v2368_v30  ;;  %v2404_v0 = vld [vmem:[%s2716_s6 + $0x344] ss:$16 sps:$4 sm:$0xff]   ;;  %v2407_v3 = vld [vmem:[%s2716_s6 + $0x340] ss:$16 sps:$4 sm:$0xff]   ;;  %v2442_v30 = vld [vmem:[%s2716_s6 + $0x88] ss:$16 sps:$4 sm:$0xff]  }
  0x33   : > { %v471_v61 = vrot.slane %v450_v59, %v2766_v50  ;;  %v2408_v4 = vld [vmem:[%s2716_s6 + $0x124] ss:$16 sps:$4 sm:$0xff]   ;;  %v2412_v6 = vld [vmem:[%s2716_s6 + $0x120] ss:$16 sps:$4 sm:$0xff]   ;;  %v2808_v15 = vcombine.high %v2801_v11, %v2801_v11  ;;  %v2472_v55 = vld [vmem:[%s2716_s6 + $0x2e8] ss:$16 sps:$4 sm:$0xff]  }
  0x34   : > { %1294 = vmatpush1.bf16.msra.mxu0 %v2370_v31  ;;  %v2410_v5 = vld [vmem:[%s2716_s6 + $0x324] ss:$16 sps:$4 sm:$0xff]   ;;  %v2413_v7 = vld [vmem:[%s2716_s6 + $0x320] ss:$16 sps:$4 sm:$0xff]   ;;  %v2483_v59 = vld [vmem:[%s2716_s6 + $0x1ac] ss:$16 sps:$4 sm:$0xff]  }
  0x35   : > { %1335 = vmatpush1.bf16.msra.mxu1 %v2371_v32  ;;  %1295 = vmatprep.subr.bf16.mxu0 %v2372_v33  ;;  %v2788_v1 = vcombine.high %v471_v61, %v471_v61  ;;  %v2414_v8 = vld [vmem:[%s2716_s6 + $0x104] ss:$16 sps:$4 sm:$0xff]   ;;  %v2418_v10 = vld [vmem:[%s2716_s6 + $0x100] ss:$16 sps:$4 sm:$0xff]   ;;  %v2450_v32 = vld [vmem:[%s2716_s6 + $0x6c] ss:$16 sps:$4 sm:$0xff]  }
  0x36   : > { %1336 = vmatprep.subr.bf16.mxu1 %v2374_v34  ;;  %1311 = vmatprep.mubr.bf16.mxu0 %v471_v61  ;;  %v2416_v9 = vld [vmem:[%s2716_s6 + $0x304] ss:$16 sps:$4 sm:$0xff]   ;;  %v2419_v12 = vld [vmem:[%s2716_s6 + $0x300] ss:$16 sps:$4 sm:$0xff]   ;;  %v2448_v34 = vld [vmem:[%s2716_s6 + $0x68] ss:$16 sps:$4 sm:$0xff]  }
  0x37   : > { %1352 = vmatprep.mubr.bf16.mxu1 %v2788_v1  ;;  %v2423_v13 = vld [vmem:[%s2716_s6 + $0x4e4] ss:$16 sps:$4 sm:$0xff]   ;;  %v2421_v16 = vld [vmem:[%s2716_s6 + $0x4e0] ss:$16 sps:$4 sm:$0xff]  }
  0x38   : > { %1296 = vmatpush2.bf16.msra.mxu0 %v2376_v35  ;;  %v2429_v18 = vld [vmem:[%s2716_s6 + $0x4c4] ss:$16 sps:$4 sm:$0xff]   ;;  %v2427_v20 = vld [vmem:[%s2716_s6 + $0x4c0] ss:$16 sps:$4 sm:$0xff]  }
  0x39   : > { %1337 = vmatpush2.bf16.msra.mxu1 %v2377_v36  ;;  %1297 = vmatprep.subr.bf16.mxu0 %v2378_v40  ;;  %v2435_v22 = vld [vmem:[%s2716_s6 + $0x4a4] ss:$16 sps:$4 sm:$0xff]   ;;  %v2433_v25 = vld [vmem:[%s2716_s6 + $0x4a0] ss:$16 sps:$4 sm:$0xff]   ;;  %v2456_v36 = vld [vmem:[%s2716_s6 + $0x4c] ss:$16 sps:$4 sm:$0xff]  }
  0x3a   : > { %1338 = vmatprep.subr.bf16.mxu1 %v2380_v41  ;;  %v2441_v27 = vld [vmem:[%s2716_s6 + $0x484] ss:$16 sps:$4 sm:$0xff]   ;;  %v2439_v29 = vld [vmem:[%s2716_s6 + $0x480] ss:$16 sps:$4 sm:$0xff]   ;;  %v2462_v40 = vld [vmem:[%s2716_s6 + $0x2c] ss:$16 sps:$4 sm:$0xff]   ;;  %v435_v41 = vcombine.high %v2775_v53, %v2775_v53 }
  0x3b   : > { %v2447_v31 = vld [vmem:[%s2716_s6 + $0x464] ss:$16 sps:$4 sm:$0xff]   ;;  %v2445_v33 = vld [vmem:[%s2716_s6 + $0x460] ss:$16 sps:$4 sm:$0xff]  }
  0x3c   : > { %1298 = vmatpush2.bf16.msra.mxu0 %v2382_v42  ;;  %v2453_v35 = vld [vmem:[%s2716_s6 + $0x444] ss:$16 sps:$4 sm:$0xff]   ;;  %v2451_v37 = vld [vmem:[%s2716_s6 + $0x440] ss:$16 sps:$4 sm:$0xff]  }
  0x3d   : > { %1339 = vmatpush2.bf16.msra.mxu1 %v2383_v45  ;;  %1299 = vmatprep.subr.bf16.mxu0 %v2384_v46  ;;  %v2459_v39 = vld [vmem:[%s2716_s6 + $0x424] ss:$16 sps:$4 sm:$0xff]   ;;  %v2457_v42 = vld [vmem:[%s2716_s6 + $0x420] ss:$16 sps:$4 sm:$0xff]   ;;  %v2468_v46 = vld [vmem:[%s2716_s6 + $0xc] ss:$16 sps:$4 sm:$0xff]  }
  0x3e   : > { %1340 = vmatprep.subr.bf16.mxu1 %v2386_v47  ;;  %v2465_v45 = vld [vmem:[%s2716_s6 + $0x404] ss:$16 sps:$4 sm:$0xff]   ;;  %v2463_v47 = vld [vmem:[%s2716_s6 + $0x400] ss:$16 sps:$4 sm:$0xff]  }
  0x40   : > { %1300 = vmatpush2.bf16.msra.mxu0 %v2388_v48  ;;  %v449_v48 = vrot.slane %v435_v41, %v2766_v50  ;;  %v2552_v41 = vld [vmem:[%s2716_s6 + $0x44c] ss:$16 sps:$4 sm:$0xff]  }
  0x41   : > { %1341 = vmatpush2.bf16.msra.mxu1 %v2389_v49  ;;  %1301 = vmatprep.subr.bf16.mxu0 %v2390_v51  ;;  %v2466_v49 = vld [vmem:[%s2716_s6 + $0x8] ss:$16 sps:$4 sm:$0xff]   ;;  %v2471_v51 = vld [vmem:[%s2716_s6 + $0x1ec] ss:$16 sps:$4 sm:$0xff]  }
  0x42   : > { %1342 = vmatprep.subr.bf16.mxu1 %v2392_v52  ;;  %v2474_v52 = vld [vmem:[%s2716_s6 + $0x2ec] ss:$16 sps:$4 sm:$0xff]   ;;  %v2849_v53 = vrot.slane %v449_v48, %v2766_v50  ;;  %v2478_v50 = vld [vmem:[%s2716_s6 + $0x2c8] ss:$16 sps:$4 sm:$0xff]  }
  0x43   : > { %v2556_v48 = vld [vmem:[%s2716_s6 + $0x428] ss:$16 sps:$4 sm:$0xff]  }
  0x44   : > { %1302 = vmatpush2.bf16.msra.mxu0 %v2394_v54  ;;  %v2469_v54 = vld [vmem:[%s2716_s6 + $0x1e8] ss:$16 sps:$4 sm:$0xff]  }
  0x45   : > { %1343 = vmatpush2.bf16.msra.mxu1 %v2395_v56  ;;  %1303 = vmatprep.subr.bf16.mxu0 %v2396_v57  ;;  %v2477_v56 = vld [vmem:[%s2716_s6 + $0x1cc] ss:$16 sps:$4 sm:$0xff]  }
  0x46   : > { %1344 = vmatprep.subr.bf16.mxu1 %v2398_v58  ;;  %v2480_v57 = vld [vmem:[%s2716_s6 + $0x2cc] ss:$16 sps:$4 sm:$0xff]   ;;  %v2475_v58 = vld [vmem:[%s2716_s6 + $0x1c8] ss:$16 sps:$4 sm:$0xff]  }
  0x48   : > { %1304 = vmatpush2.bf16.msra.mxu0 %v2400_v60  ;;  %v2486_v60 = vld [vmem:[%s2716_s6 + $0x2ac] ss:$16 sps:$4 sm:$0xff]  }
  0x49   : > { %1345 = vmatpush2.bf16.msra.mxu1 %v2401_v62  ;;  %1305 = vmatprep.subr.bf16.mxu0 %v2402_v63  ;;  %v2484_v62 = vld [vmem:[%s2716_s6 + $0x2a8] ss:$16 sps:$4 sm:$0xff]   ;;  %v2489_v63 = vld [vmem:[%s2716_s6 + $0x18c] ss:$16 sps:$4 sm:$0xff]  }
  0x4a   : > { %1346 = vmatprep.subr.bf16.mxu1 %v2404_v0  ;;  %v2492_v0 = vld [vmem:[%s2716_s6 + $0x28c] ss:$16 sps:$4 sm:$0xff]  }
  0x4c   : > { %1306 = vmatpush2.bf16.msra.mxu0 %v2406_v2  ;;  %v2487_v2 = vld [vmem:[%s2716_s6 + $0x188] ss:$16 sps:$4 sm:$0xff]  }
  0x4d   : > { %1347 = vmatpush2.bf16.msra.mxu1 %v2407_v3  ;;  %1307 = vmatprep.subr.bf16.mxu0 %v2408_v4  ;;  %v2490_v3 = vld [vmem:[%s2716_s6 + $0x288] ss:$16 sps:$4 sm:$0xff]   ;;  %v2498_v4 = vld [vmem:[%s2716_s6 + $0x26c] ss:$16 sps:$4 sm:$0xff]  }
  0x4e   : > { %1348 = vmatprep.subr.bf16.mxu1 %v2410_v5  ;;  %v2493_v5 = vld [vmem:[%s2716_s6 + $0x168] ss:$16 sps:$4 sm:$0xff]  }
  0x50   : > { %1308 = vmatpush2.bf16.msra.mxu0 %v2412_v6  ;;  %v2496_v6 = vld [vmem:[%s2716_s6 + $0x268] ss:$16 sps:$4 sm:$0xff]  }
  0x51   : > { %1349 = vmatpush2.bf16.msra.mxu1 %v2413_v7  ;;  %1309 = vmatprep.subr.bf16.mxu0 %v2414_v8  ;;  %v2501_v7 = vld [vmem:[%s2716_s6 + $0x14c] ss:$16 sps:$4 sm:$0xff]  }
  0x52   : > { %1350 = vmatprep.subr.bf16.mxu1 %v2416_v9  ;;  %v2504_v8 = vld [vmem:[%s2716_s6 + $0x24c] ss:$16 sps:$4 sm:$0xff]   ;;  %v2499_v9 = vld [vmem:[%s2716_s6 + $0x148] ss:$16 sps:$4 sm:$0xff]  }
  0x54   : > { %1310 = vmatpush2.bf16.msra.mxu0 %v2418_v10  ;;  %v2502_v10 = vld [vmem:[%s2716_s6 + $0x248] ss:$16 sps:$4 sm:$0xff]  }
  0x55   : > { %1351 = vmatpush2.bf16.msra.mxu1 %v2419_v12  ;;  %1361 = vmatprep.subr.bf16.mxu0 %v2423_v13  ;;  %v2507_v12 = vld [vmem:[%s2716_s6 + $0x12c] ss:$16 sps:$4 sm:$0xff]  }
  0x56   : > { %1402 = vmatprep.subr.bf16.mxu1 %v2426_v14  ;;  %v2510_v13 = vld [vmem:[%s2716_s6 + $0x22c] ss:$16 sps:$4 sm:$0xff]   ;;  %v2505_v14 = vld [vmem:[%s2716_s6 + $0x128] ss:$16 sps:$4 sm:$0xff]  }
  0x57   : > { %1312 = vmatmul.mubr.bf16.vlgmr.msra.gmra.mxu0 %v2801_v11 }
  0x58   : > { %1353 = vmatmul.mubr.bf16.vlgmr.msra.gmra.mxu1 %v2808_v15  ;;  %1362 = vmatpush1.bf16.msra.mxu0 %v2421_v16  ;;  %v2508_v16 = vld [vmem:[%s2716_s6 + $0x228] ss:$16 sps:$4 sm:$0xff]  }
  0x59   : > { %1403 = vmatpush1.bf16.msra.mxu1 %v2424_v17  ;;  %1363 = vmatprep.subr.bf16.mxu0 %v2429_v18  ;;  %v2513_v17 = vld [vmem:[%s2716_s6 + $0x10c] ss:$16 sps:$4 sm:$0xff]  }
  0x5a   : > { %1404 = vmatprep.subr.bf16.mxu1 %v2432_v19  ;;  %1393 = vmatprep.mubr.bf16.mxu0 %v2651_v24  ;;  %v2516_v18 = vld [vmem:[%s2716_s6 + $0x20c] ss:$16 sps:$4 sm:$0xff]   ;;  %v2511_v19 = vld [vmem:[%s2716_s6 + $0x108] ss:$16 sps:$4 sm:$0xff]  }
  0x5b   : > { %1434 = vmatprep.mubr.bf16.mxu1 %v471_v61  ;;  %v2481_v61 = vld [vmem:[%s2716_s6 + $0x1a8] ss:$16 sps:$4 sm:$0xff]  }
  0x5c   : > { %1364 = vmatpush1.bf16.msra.mxu0 %v2427_v20  ;;  %v2514_v20 = vld [vmem:[%s2716_s6 + $0x208] ss:$16 sps:$4 sm:$0xff]  }
  0x5d   : > { %1405 = vmatpush1.bf16.msra.mxu1 %v2430_v21  ;;  %1365 = vmatprep.subr.bf16.mxu0 %v2435_v22  ;;  %v2519_v21 = vld [vmem:[%s2716_s6 + $0x3ec] ss:$16 sps:$4 sm:$0xff]  }
  0x5e   : > { %1406 = vmatprep.subr.bf16.mxu1 %v2438_v23  ;;  %v2522_v22 = vld [vmem:[%s2716_s6 + $0x4ec] ss:$16 sps:$4 sm:$0xff]   ;;  %v2517_v23 = vld [vmem:[%s2716_s6 + $0x3e8] ss:$16 sps:$4 sm:$0xff]  }
  0x60   : > { %1366 = vmatpush1.bf16.msra.mxu0 %v2433_v25  ;;  %v2520_v25 = vld [vmem:[%s2716_s6 + $0x4e8] ss:$16 sps:$4 sm:$0xff]  }
  0x61   : > { %1407 = vmatpush1.bf16.msra.mxu1 %v2436_v26  ;;  %1367 = vmatprep.subr.bf16.mxu0 %v2441_v27  ;;  %v2525_v26 = vld [vmem:[%s2716_s6 + $0x3cc] ss:$16 sps:$4 sm:$0xff]  }
  0x62   : > { %1408 = vmatprep.subr.bf16.mxu1 %v2444_v28  ;;  %v2528_v27 = vld [vmem:[%s2716_s6 + $0x4cc] ss:$16 sps:$4 sm:$0xff]   ;;  %v2523_v28 = vld [vmem:[%s2716_s6 + $0x3c8] ss:$16 sps:$4 sm:$0xff]  }
  0x64   : > { %1368 = vmatpush1.bf16.msra.mxu0 %v2439_v29  ;;  %v2526_v29 = vld [vmem:[%s2716_s6 + $0x4c8] ss:$16 sps:$4 sm:$0xff]  }
  0x65   : > { %1409 = vmatpush1.bf16.msra.mxu1 %v2442_v30  ;;  %1369 = vmatprep.subr.bf16.mxu0 %v2447_v31  ;;  %v2531_v30 = vld [vmem:[%s2716_s6 + $0x3ac] ss:$16 sps:$4 sm:$0xff]  }
  0x66   : > { %1410 = vmatprep.subr.bf16.mxu1 %v2450_v32  ;;  %v2534_v31 = vld [vmem:[%s2716_s6 + $0x4ac] ss:$16 sps:$4 sm:$0xff]   ;;  %v2529_v32 = vld [vmem:[%s2716_s6 + $0x3a8] ss:$16 sps:$4 sm:$0xff]  }
  0x68   : > { %1370 = vmatpush1.bf16.msra.mxu0 %v2445_v33  ;;  %v2537_v33 = vld [vmem:[%s2716_s6 + $0x38c] ss:$16 sps:$4 sm:$0xff]  }
  0x69   : > { %1411 = vmatpush1.bf16.msra.mxu1 %v2448_v34  ;;  %1371 = vmatprep.subr.bf16.mxu0 %v2453_v35  ;;  %v2540_v34 = vld [vmem:[%s2716_s6 + $0x48c] ss:$16 sps:$4 sm:$0xff]   ;;  %v2535_v35 = vld [vmem:[%s2716_s6 + $0x388] ss:$16 sps:$4 sm:$0xff]  }
  0x6a   : > { %1412 = vmatprep.subr.bf16.mxu1 %v2456_v36  ;;  %v2538_v36 = vld [vmem:[%s2716_s6 + $0x488] ss:$16 sps:$4 sm:$0xff]  }
  0x6c   : > { %1372 = vmatpush1.bf16.msra.mxu0 %v2451_v37  ;;  %v2546_v37 = vld [vmem:[%s2716_s6 + $0x46c] ss:$16 sps:$4 sm:$0xff]  }
  0x6d   : > { %1413 = vmatpush1.bf16.msra.mxu1 %v2454_v38  ;;  %1373 = vmatprep.subr.bf16.mxu0 %v2459_v39  ;;  %v2541_v38 = vld [vmem:[%s2716_s6 + $0x368] ss:$16 sps:$4 sm:$0xff]  }
  0x6e   : > { %1414 = vmatprep.subr.bf16.mxu1 %v2462_v40  ;;  %v2544_v39 = vld [vmem:[%s2716_s6 + $0x468] ss:$16 sps:$4 sm:$0xff]   ;;  %v2549_v40 = vld [vmem:[%s2716_s6 + $0x34c] ss:$16 sps:$4 sm:$0xff]  }
  0x70   : > { %1374 = vmatpush1.bf16.msra.mxu0 %v2457_v42  ;;  %v2547_v42 = vld [vmem:[%s2716_s6 + $0x348] ss:$16 sps:$4 sm:$0xff]  }
  0x71   : > { %1415 = vmatpush1.bf16.msra.mxu1 %v2460_v43  ;;  %1375 = vmatprep.subr.bf16.mxu0 %v2465_v45  ;;  %v2550_v43 = vld [vmem:[%s2716_s6 + $0x448] ss:$16 sps:$4 sm:$0xff]   ;;  %v2555_v45 = vld [vmem:[%s2716_s6 + $0x32c] ss:$16 sps:$4 sm:$0xff]  }
  0x72   : > { %1416 = vmatprep.subr.bf16.mxu1 %v2468_v46  ;;  %v2558_v46 = vld [vmem:[%s2716_s6 + $0x42c] ss:$16 sps:$4 sm:$0xff]  }
  0x74   : > { %1376 = vmatpush1.bf16.msra.mxu0 %v2463_v47  ;;  %v2553_v47 = vld [vmem:[%s2716_s6 + $0x328] ss:$16 sps:$4 sm:$0xff]  }
  0x75   : > { %1417 = vmatpush1.bf16.msra.mxu1 %v2466_v49  ;;  %1443 = vmatprep.subr.bf16.mxu0 %v2474_v52  ;;  %v2561_v49 = vld [vmem:[%s2716_s6 + $0x30c] ss:$16 sps:$4 sm:$0xff]   ;;  %v2559_v52 = vld [vmem:[%s2716_s6 + $0x308] ss:$16 sps:$4 sm:$0xff]  }
  0x76   : > { %1418 = vmatprep.subr.bf16.mxu1 %v2471_v51  ;;  %v2564_v51 = vld [vmem:[%s2716_s6 + $0x40c] ss:$16 sps:$4 sm:$0xff]  }
  0x77   : > { %1394 = vmatmul.mubr.bf16.vlgmr.msra.gmra.mxu0 %v2849_v53 }
  0x78   : > { %1444 = vmatpush1.bf16.msra.mxu0 %v2472_v55  ;;  %1475 = vmatprep.mubr.bf16.mxu0 %v2788_v1  ;;  %v2495_v1 = vld [vmem:[%s2716_s6 + $0x16c] ss:$16 sps:$4 sm:$0xff]  }
  0x79   : > { %1419 = vmatpush2.bf16.msra.mxu1 %v2469_v54  ;;  %1445 = vmatprep.subr.bf16.mxu0 %v2480_v57  ;;  %v2562_v54 = vld [vmem:[%s2716_s6 + $0x408] ss:$16 sps:$4 sm:$0xff]  }
  0x7a   : > { %1420 = vmatprep.subr.bf16.mxu1 %v2477_v56 }
  0x7c   : > { %1446 = vmatpush1.bf16.msra.mxu0 %v2478_v50 }
  0x7d   : > { %1421 = vmatpush2.bf16.msra.mxu1 %v2475_v58  ;;  %1447 = vmatprep.subr.bf16.mxu0 %v2486_v60 }
  0x7e   : > { %1422 = vmatprep.subr.bf16.mxu1 %v2483_v59 }
  0x80   : > { %1448 = vmatpush1.bf16.msra.mxu0 %v2484_v62 }
  0x81   : > { %1423 = vmatpush2.bf16.msra.mxu1 %v2481_v61  ;;  %1449 = vmatprep.subr.bf16.mxu0 %v2492_v0 }
  0x82   : > { %1424 = vmatprep.subr.bf16.mxu1 %v2489_v63 }
  0x84   : > { %1450 = vmatpush1.bf16.msra.mxu0 %v2490_v3 }
  0x85   : > { %1425 = vmatpush2.bf16.msra.mxu1 %v2487_v2  ;;  %1451 = vmatprep.subr.bf16.mxu0 %v2498_v4 }
  0x86   : > { %1426 = vmatprep.subr.bf16.mxu1 %v2495_v1 }
  0x88   : > { %1452 = vmatpush1.bf16.msra.mxu0 %v2496_v6 }
  0x89   : > { %1427 = vmatpush2.bf16.msra.mxu1 %v2493_v5  ;;  %1453 = vmatprep.subr.bf16.mxu0 %v2504_v8 }
  0x8a   : > { %1428 = vmatprep.subr.bf16.mxu1 %v2501_v7 }
  0x8c   : > { %1454 = vmatpush1.bf16.msra.mxu0 %v2502_v10 }
  0x8d   : > { %1429 = vmatpush2.bf16.msra.mxu1 %v2499_v9  ;;  %1455 = vmatprep.subr.bf16.mxu0 %v2510_v13  ;;  %v2652_v9 = vmov 1983009808  }
  0x8e   : > { %1430 = vmatprep.subr.bf16.mxu1 %v2507_v12  ;;  %v1532_v10 = vunpack.c.l.s4 %v2652_v9 }
  0x90   : > { %1456 = vmatpush1.bf16.msra.mxu0 %v2508_v16 }
  0x91   : > { %1431 = vmatpush2.bf16.msra.mxu1 %v2505_v14  ;;  %1457 = vmatprep.subr.bf16.mxu0 %v2516_v18  ;;  %v1533_v14 = vunpack.c.0.s8 %v1532_v10 }
  0x92   : > { %1432 = vmatprep.subr.bf16.mxu1 %v2513_v17 }
  0x94   : > { %1458 = vmatpush1.bf16.msra.mxu0 %v2514_v20 }
  0x95   : > { %1433 = vmatpush2.bf16.msra.mxu1 %v2511_v19  ;;  %1459 = vmatprep.subr.bf16.mxu0 %v2519_v21 }
  0x96   : > { %1484 = vmatprep.subr.bf16.mxu1 %v2522_v22  ;;  %v2920_v22 = vsub.s32 %v1533_v14, %v2758_v44 }
  0x98   : > { %1435 = vmatmul.mubr.bf16.vlgmr.msra.gmra.mxu1 %v2801_v11  ;;  %1460 = vmatpush2.bf16.msra.mxu0 %v2517_v23  ;;  %v2532_v11 = vld [vmem:[%s2716_s6 + $0x4a8] ss:$16 sps:$4 sm:$0xff]  }
  0x99   : > { %1485 = vmatpush1.bf16.msra.mxu1 %v2520_v25  ;;  %1461 = vmatprep.subr.bf16.mxu0 %v2525_v26 }
  0x9a   : > { %1486 = vmatprep.subr.bf16.mxu1 %v2528_v27  ;;  %1516 = vmatprep.mubr.bf16.mxu1 %v2651_v24  ;;  %v2543_v24 = vld [vmem:[%s2716_s6 + $0x36c] ss:$16 sps:$4 sm:$0xff]  }
  0x9c   : > { %1462 = vmatpush2.bf16.msra.mxu0 %v2523_v28 }
  0x9d   : > { %1487 = vmatpush1.bf16.msra.mxu1 %v2526_v29  ;;  %1463 = vmatprep.subr.bf16.mxu0 %v2531_v30 }
  0x9e   : > { %1488 = vmatprep.subr.bf16.mxu1 %v2534_v31  ;;  %v272_v31 = vld [vmem:[#allocation2] sm:$0xff] }
  0xa0   : > { %1464 = vmatpush2.bf16.msra.mxu0 %v2529_v32 }
  0xa1   : > { %1489 = vmatpush1.bf16.msra.mxu1 %v2532_v11  ;;  %1465 = vmatprep.subr.bf16.mxu0 %v2537_v33 }
  0xa2   : > { %1490 = vmatprep.subr.bf16.mxu1 %v2540_v34 }
  0xa4   : > { %1466 = vmatpush2.bf16.msra.mxu0 %v2535_v35 }
  0xa5   : > { %1491 = vmatpush1.bf16.msra.mxu1 %v2538_v36  ;;  %1467 = vmatprep.subr.bf16.mxu0 %v2543_v24 }
  0xa6   : > { %1492 = vmatprep.subr.bf16.mxu1 %v2546_v37 }
  0xa8   : > { %1468 = vmatpush2.bf16.msra.mxu0 %v2541_v38 }
  0xa9   : > { %1493 = vmatpush1.bf16.msra.mxu1 %v2544_v39  ;;  %1469 = vmatprep.subr.bf16.mxu0 %v2549_v40 }
  0xaa   : > { %1494 = vmatprep.subr.bf16.mxu1 %v2552_v41 }
  0xac   : > { %1470 = vmatpush2.bf16.msra.mxu0 %v2547_v42 }
  0xad   : > { %1495 = vmatpush1.bf16.msra.mxu1 %v2550_v43  ;;  %1471 = vmatprep.subr.bf16.mxu0 %v2555_v45 }
  0xae   : > { %1496 = vmatprep.subr.bf16.mxu1 %v2558_v46 }
  0xb0   : > { %1472 = vmatpush2.bf16.msra.mxu0 %v2553_v47 }
  0xb1   : > { %1497 = vmatpush1.bf16.msra.mxu1 %v2556_v48  ;;  %1473 = vmatprep.subr.bf16.mxu0 %v2561_v49 }
  0xb2   : > { %1498 = vmatprep.subr.bf16.mxu1 %v2564_v51 }
  0xb4   : > { %1474 = vmatpush2.bf16.msra.mxu0 %v2559_v52 }
  0xb5   : > { %1499 = vmatpush1.bf16.msra.mxu1 %v2562_v54 }
  0xb7   : > { %1476 = vmatmul.mubr.bf16.vlgmr.msra.gmra.mxu0 %v2808_v15 }
  0xb8   : > { %1517 = vmatmul.mubr.bf16.vlgmr.msra.gmra.mxu1 %v2849_v53 }
 0x117   : > { %v1313_v55 = vpop.f32.mrf.mxu0 }
 0x118   : > { %v1354_v56 = vpop.f32.mrf.mxu1 }
 0x119   : > { %v1355_v57 = vadd.f32 %v1354_v56, %v1313_v55  ;;  %v1315_v58 = vpop.f32.mrf.mxu0 }
 0x11a   : > { %v1356_v50 = vpop.f32.mrf.mxu1 }
 0x11b   : > { %v1357_v59 = vadd.f32 %v1356_v50, %v1315_v58  ;;  %v1317_v60 = vpop.f32.mrf.mxu0 }
 0x11c   : > { %v1358_v61 = vpop.f32.mrf.mxu1 }
 0x11d   : > { %v1318_v62 = vpop.f32.mrf.mxu0 }
 0x11e   : > { %v1359_v63 = vpop.f32.mrf.mxu1 }
 0x137   : > { %v1395_v0 = vpop.f32.mrf.mxu0 }
 0x138   : > { %v1396_v2 = vadd.f32 %v1395_v0, %v1355_v57 }
 0x139   : > { %v1397_v3 = vpop.f32.mrf.mxu0 }
 0x13a   : > { %v1398_v1 = vadd.f32 %v1397_v3, %v1357_v59 }
 0x13b   : > { %v1399_v4 = vpop.f32.mrf.mxu0 }
 0x13c   : > { %v1529_v5 = vcombine.low %v1396_v2, %v1398_v1 }
 0x13d   : > { %v1400_v6 = vpop.f32.mrf.mxu0 }
 0x13e   : > { %v1537_v29 = vrot.slane %v1529_v5, %v2920_v22 }
 0x158   : > { %v1436_v15 = vpop.f32.mrf.mxu1 }
 0x15a   : > { %v1438_v7 = vpop.f32.mrf.mxu1 }
 0x15c   : > { %v1440_v53 = vpop.f32.mrf.mxu1 }
 0x15e   : > { %v1441_v8 = vpop.f32.mrf.mxu1 }
 0x177   : > { %v1477_v12 = vpop.f32.mrf.mxu0 }
 0x178   : > { %v1518_v13 = vpop.f32.mrf.mxu1  ;;  %v1478_v16 = vadd.f32 %v1477_v12, %v1436_v15 }
 0x179   : > { %v1479_v17 = vpop.f32.mrf.mxu0 }
 0x17a   : > { %v1520_v18 = vpop.f32.mrf.mxu1  ;;  %v1480_v19 = vadd.f32 %v1479_v17, %v1438_v7  ;;  %v1519_v23 = vadd.f32 %v1518_v13, %v1478_v16 }
 0x17b   : > { %v1481_v20 = vpop.f32.mrf.mxu0 }
 0x17c   : > { %v1522_v21 = vpop.f32.mrf.mxu1  ;;  %v1521_v25 = vadd.f32 %v1520_v18, %v1480_v19 }
 0x17d   : > { %v1482_v26 = vpop.f32.mrf.mxu0 }
 0x17e   : > { %v1523_v27 = vpop.f32.mrf.mxu1  ;;  %v1530_v28 = vcombine.low %v1519_v23, %v1521_v25 }
 0x180   : > { %v1544_v30 = vrot.slane %v1530_v28, %v2920_v22 }
 0x182   : > { %v1545_v32 = vcombine.low %v1537_v29, %v1544_v30  ;;  %1552 = sbr.rel (%p2206_p7) target bundleno = 627 (0x273), region = 48 }
 0x184   : > { %v1547_v11 = vadd.f32 %v1545_v32, %v272_v31 }
 0x186   : > { %1548 = vst [vmem:[#allocation2] sm:$0xff] %v1547_v11 }
 0x187   : > { %v2565_v33 = vld [vmem:[%s3064_s3 + $0x78] sm:$0xff]   ;;  %v2569_v24 = vld [vmem:[%s3064_s3 + $0x70] sm:$0xff]   ;;  %v2573_v40 = vld [vmem:[%s3064_s3 + $0x68] sm:$0xff]   ;;  %v1558_v61 = vsub.s32 0, %v2758_v44  ;;  %v1562_v63 = vsub.s32 1, %v2758_v44  ;;  %v1566_v2 = vsub.s32 2, %v2758_v44 }
 0x188   : > { %v2566_v34 = vld [vmem:[%s3064_s3 + $0xf8] sm:$0xff]   ;;  %2245 = vmatprep.subr.bf16.mxu0 %v2565_v33  ;;  %v2570_v37 = vld [vmem:[%s3064_s3 + $0xf0] sm:$0xff]   ;;  %v2574_v41 = vld [vmem:[%s3064_s3 + $0xe8] sm:$0xff]   ;;  %v1570_v1 = vsub.s32 3, %v2758_v44  ;;  %vm1963_vm1 = vcmask 41984  }
 0x189   : > { %v2567_v35 = vld [vmem:[%s3064_s3 + $0x38] sm:$0xff]   ;;  %2267 = vmatprep.subr.bf16.mxu1 %v2566_v34  ;;  %v2571_v38 = vld [vmem:[%s3064_s3 + $0x30] sm:$0xff]   ;;  %v2575_v42 = vld [vmem:[%s3064_s3 + $0x28] sm:$0xff]  }
 0x18a   : > { %v2568_v36 = vld [vmem:[%s3064_s3 + $0xb8] sm:$0xff]   ;;  %2246 = vmatpush3.bf16.msra.mxu0 %v2567_v35  ;;  %v2572_v39 = vld [vmem:[%s3064_s3 + $0xb0] sm:$0xff]   ;;  %v2576_v43 = vld [vmem:[%s3064_s3 + $0xa8] sm:$0xff]  }
 0x18b   : > { %2268 = vmatpush3.bf16.msra.mxu1 %v2568_v36  ;;  %2247 = vmatprep.subr.bf16.mxu0 %v2569_v24  ;;  %v2577_v45 = vld [vmem:[%s3064_s3 + $0x60] sm:$0xff]   ;;  %v2581_v49 = vld [vmem:[%s3064_s3 + $0x58] sm:$0xff]   ;;  %v2585_v55 = vld [vmem:[%s3064_s3 + $0x50] sm:$0xff]  }
 0x18c   : > { %2269 = vmatprep.subr.bf16.mxu1 %v2570_v37  ;;  %v2578_v46 = vld [vmem:[%s3064_s3 + $0xe0] sm:$0xff]   ;;  %v2582_v51 = vld [vmem:[%s3064_s3 + $0xd8] sm:$0xff]   ;;  %v2586_v56 = vld [vmem:[%s3064_s3 + $0xd0] sm:$0xff]  }
 0x18d   : > { %v2579_v47 = vld [vmem:[%s3064_s3 + $0x20] sm:$0xff]   ;;  %v2583_v52 = vld [vmem:[%s3064_s3 + $0x18] sm:$0xff]   ;;  %v2587_v57 = vld [vmem:[%s3064_s3 + $0x10] sm:$0xff]  }
 0x18e   : > { %2248 = vmatpush3.bf16.msra.mxu0 %v2571_v38  ;;  %v2580_v48 = vld [vmem:[%s3064_s3 + $0xa0] sm:$0xff]   ;;  %v2584_v54 = vld [vmem:[%s3064_s3 + $0x98] sm:$0xff]   ;;  %v2588_v58 = vld [vmem:[%s3064_s3 + $0x90] sm:$0xff]  }
 0x18f   : > { %2270 = vmatpush3.bf16.msra.mxu1 %v2572_v39  ;;  %2249 = vmatprep.subr.bf16.mxu0 %v2573_v40  ;;  %v2589_v50 = vld [vmem:[%s3064_s3 + $0x48] sm:$0xff]   ;;  %v2593_v0 = vld [vmem:[%s3064_s3 + $0x40] sm:$0xff]  }
 0x190   : > { %2271 = vmatprep.subr.bf16.mxu1 %v2574_v41  ;;  %v2590_v59 = vld [vmem:[%s3064_s3 + $0xc8] sm:$0xff]   ;;  %v2594_v3 = vld [vmem:[%s3064_s3 + $0xc0] sm:$0xff]  }
 0x191   : > { %v2591_v60 = vld [vmem:[%s3064_s3 + $0x8] sm:$0xff]   ;;  %v2595_v4 = vld [vmem:[%s3064_s3] sm:$0xff]  }
 0x192   : > { %2250 = vmatpush3.bf16.msra.mxu0 %v2575_v42  ;;  %v2592_v62 = vld [vmem:[%s3064_s3 + $0x88] sm:$0xff]   ;;  %v2596_v5 = vld [vmem:[%s3064_s3 + $0x80] sm:$0xff]  }
 0x193   : > { %2272 = vmatpush3.bf16.msra.mxu1 %v2576_v43  ;;  %2251 = vmatprep.subr.bf16.mxu0 %v2577_v45  ;;  %v1554_v6 = vld [vmem:[%s3063_s2] sm:$0xf] }
 0x194   : > { %2273 = vmatprep.subr.bf16.mxu1 %v2578_v46  ;;  %v1559_v15 = vrot.slane %v1554_v6, %v1558_v61  ;;  %v1563_v7 = vrot.slane %v1554_v6, %v1562_v63  ;;  %v1567_v53 = vrot.slane %v1554_v6, %v1566_v2  ;;  %v1571_v44 = vrot.slane %v1554_v6, %v1570_v1  ;;  %v1553_v13 = vld [vmem:[#allocation2] sm:$0xff] }
 0x195   : > { %v2207_v32 = vld [vmem:[%s3065_s4] ss:$0 sm:$0xff] }
 0x196   : > { %2252 = vmatpush3.bf16.msra.mxu0 %v2579_v47  ;;  %v1572_v8 = vcombine.low %v1559_v15, %v1563_v7  ;;  %v1573_v9 = vcombine.low %v1567_v53, %v1571_v44 }
 0x197   : > { %2274 = vmatpush3.bf16.msra.mxu1 %v2580_v48  ;;  %2253 = vmatprep.subr.bf16.mxu0 %v2581_v49 }
 0x198   : > { %2275 = vmatprep.subr.bf16.mxu1 %v2582_v51  ;;  %v1580_v10 = vrot.slane %v1572_v8, %v2920_v22  ;;  %v1587_v12 = vrot.slane %v1573_v9, %v2920_v22 }
 0x19a   : > { %2254 = vmatpush3.bf16.msra.mxu0 %v2583_v52  ;;  %v1588_v14 = vcombine.low %v1580_v10, %v1587_v12 }
 0x19b   : > { %2276 = vmatpush3.bf16.msra.mxu1 %v2584_v54  ;;  %2255 = vmatprep.subr.bf16.mxu0 %v2585_v55 }
 0x19c   : > { %2277 = vmatprep.subr.bf16.mxu1 %v2586_v56  ;;  %v1590_v16 = vadd.f32 %v1588_v14, %v1553_v13 }
 0x19e   : > { %2256 = vmatpush3.bf16.msra.mxu0 %v2587_v57  ;;  %vm1591_vm0 = vcmp.ge.f32.partialorder %v1590_v16, 0.0  ;;  %v1592_v17 = vmul.f32 0.01, %v1590_v16 }
 0x19f   : > { %2278 = vmatpush3.bf16.msra.mxu1 %v2588_v58  ;;  %2257 = vmatprep.subr.bf16.mxu0 %v2589_v50 }
 0x1a0   : > { %2279 = vmatprep.subr.bf16.mxu1 %v2590_v59  ;;  %v1593_v18 = vsel %vm1591_vm0, %v1590_v16, %v1592_v17 }
 0x1a1   : > { %v1602_v19 = vrot.slane %v1593_v18, %v2920_v22  ;;  %v1595_v20 = vcombine.high %v1593_v18, %v1593_v18 }
 0x1a2   : > { %2258 = vmatpush3.bf16.msra.mxu0 %v2591_v60 }
 0x1a3   : > { %2280 = vmatpush3.bf16.msra.mxu1 %v2592_v62  ;;  %2259 = vmatprep.subr.bf16.mxu0 %v2593_v0  ;;  %v1610_v21 = vcombine.high %v1602_v19, %v1602_v19  ;;  %v1609_v23 = vrot.slane %v1595_v20, %v2920_v22  ;;  %v1616_v25 = vpack.c.bf16 %v1602_v19, %v1602_v19 }
 0x1a4   : > { %2281 = vmatprep.subr.bf16.mxu1 %v2594_v3 }
 0x1a5   : > { %v1617_v26 = vpack.c.bf16 %v1610_v21, %v1610_v21  ;;  %v1611_v27 = vcombine.high %v1609_v23, %v1609_v23  ;;  %v1618_v28 = vpack.c.bf16 %v1609_v23, %v1609_v23 }
 0x1a6   : > { %2260 = vmatpush3.bf16.msra.mxu0 %v2595_v4 }
 0x1a7   : > { %2282 = vmatpush3.bf16.msra.mxu1 %v2596_v5  ;;  %1915 = vmatprep.mubr.bf16.mxu0 %v1617_v26  ;;  %v1619_v29 = vpack.c.bf16 %v1611_v27, %v1611_v27 }
 0x1a9   : > { %1916 = vmatmul.mubr.bf16.vlgmr.msra.gmra.mxu0 %v1616_v25  ;;  %1955 = vmatprep.mubr.bf16.mxu1 %v1619_v29 }
 0x1aa   : > { %1956 = vmatmul.mubr.bf16.vlgmr.msra.gmra.mxu1 %v1618_v28 }
 0x269   : > { %v2261_v30 = vpop.f32.mrf.mxu0 }
 0x26a   : > { %v2283_v31 = vpop.f32.mrf.mxu1 }
 0x26b   : > { %v2262_v11 = vpop.f32.mrf.mxu0 }
 0x26c   : > { %v2263_v33 = vadd.f32 %v2262_v11, %v2261_v30  ;;  %v2284_v34 = vpop.f32.mrf.mxu1 }
 0x26d   : > { %v2264_v35 = vpop.f32.mrf.mxu0  ;;  %v2285_v36 = vadd.f32 %v2284_v34, %v2283_v31 }
 0x26e   : > { %v1918_v22 = vadd.f32 %v2263_v33, %v2207_v32  ;;  %v2286_v24 = vpop.f32.mrf.mxu1 }
 0x26f   : > { %v2265_v37 = vpop.f32.mrf.mxu0 }
 0x270   : > { %v1958_v38 = vadd.f32 %v2285_v36, %v1918_v22  ;;  %v2287_v39 = vpop.f32.mrf.mxu1 }
 0x272   : > { %1964 = vst.msk [vmem:[#allocation3] sm:$0x3] %vm1963_vm1, %v1958_v38 }
 0x273 PF: > { %p3037_p8 = scmp.eq.s32.totalorder %s2039_s21, 4  ;;  %s2653_s15 = smov [#allocation3]  }
 0x274   : > { %s1974_s16 = sshll.u32 %s2653_s15, 4  ;;  %s1975_s16 = int_to_ptr.vmem [resolvable:$true] %s1974_s16 }
 0x275   : > { %s2597_s17 = scalar_lea.vmem %s1975_s16, 32  ;;  %p2604_p12 = scmp.lt.s32.totalorder %s1975_s16, %s1975_s16 }
 0x276   : > { %p2598_p9 = scmp.ne.s32.totalorder %s1975_s16, %s2597_s17  ;;  %p2605_p13 = scmp.lt.s32.totalorder %s2597_s17, %s2597_s17 }
 0x278   : > { %p2599_p10 = pnand %p2598_p9, %p3037_p8  ;;  %p2606_p0 = por %p2605_p13, %p2604_p12 }
 0x27a   : > { %p2600_p11 = pneg %p2599_p10 }
 0x27c   : > { %p2607_p1 = pnand %p2606_p0, %p2600_p11 }
 0x27e   : > { %2610 = shalt.err (!%p2607_p1)
}
 0x27f   : > { %2290 = dma.vmem_to_hbm [thread:$0]  (%p3037_p8), %s1975_s16, 32, %s3066_s5, [#allocation4]  }
 0x280   : > { %2634 = dma.done.wait (%p3037_p8), [#allocation4], 32  }
 0x281   : > { %2636 = vsyncadd (%p3037_p8), [#allocation4], 4294967264 }
 0x282 PF: > { %s16_s20 = sadd.s32 1, %s2647_s20   ;;  %s3068_s18 = smov %s2643_s19 }
 0x283   : > { %p13_p2 = scmp.ge.s32.totalorder %s16_s20, 7   ;;  %s3069_s19 = smov %s3071_s22 }
 0x285   :  { %15 = sbr.rel (!%p13_p2) target bundleno = 2 (0x2), region = 79 }
 0x28a   :  { %1987 = vsyncpa [#allocation4], 1 }
 0x28b   :  { %1989 = vsyncpa [#allocation4 + $0x1], 1 }

</bundles_post_ra>
